<compile_context>
chip_gen: v6e
topology: v6e:2x2x1
jax: 0.10.0
libtpu: 0.0.40
codegen_flags: <defaults>
</compile_context>

<pallas_src>
import functools

import jax
import jax.numpy as jnp
from jax.experimental import pallas as pl
from jax.experimental.pallas import tpu as pltpu

# Optional: carry the x / y_fno streams of pass A in bf16 (f32 accumulation and
# f32 BN/GELU).  Saves HBM traffic on v6e/v7x but deviates ~1e-3 from the f32
# PyTorch reference, so it is off by default.
USE_BF16_STREAMS = False

_EPS = 1e-5
_SQRT1_2 = 0.7071067811865476


# ---------------------------------------------------------------------------
# Generation-aware sizing helpers
# ---------------------------------------------------------------------------
def _tpu_vmem_capacity():
    try:
        cap = int(getattr(pltpu.get_tpu_info(), "vmem_capacity_bytes", 0))
        if cap > 0:
            return cap
    except Exception:
        pass
    return 64 * 1024 * 1024            # conservative (v7x-sized) fallback


def _vmem_limit_bytes():
    """Scoped-VMEM limit: ~60% of physical, capped (v7x has only 64 MiB)."""
    return min((_tpu_vmem_capacity() * 3) // 5, 80 * 1024 * 1024)


def _per_step_budget_bytes():
    """Target double-buffered working set per grid step."""
    cap = _tpu_vmem_capacity()
    return 12 * 1024 * 1024 if cap <= 64 * 1024 * 1024 else 24 * 1024 * 1024


def _pick_tile(n, max_tile, unit):
    """Largest multiple of `unit` <= max_tile dividing n; fallback: full extent."""
    t = min(max_tile, (n // unit) * unit)
    while t >= unit:
        if n % t == 0:
            return t
        t -= unit
    return n


def _plan_pixel_tiling(hw, cin, cout):
    """Pixels laid out as (rows, 128) lanes.  Returns (rows_padded, tsA, tsB).

    Tile sizes (sublane rows per grid step) are chosen so the double-buffered
    working set stays inside the per-generation budget; the row count is padded
    so the grid always divides evenly (padded tail pixels are exactly zero).
    """
    budget = _per_step_budget_bytes()
    bpe = 2 if USE_BF16_STREAMS else 4
    row_a = 2 * 128 * (bpe * (cin + cout) + 4 * cout)   # x + yf in, z out (dbl-buf)
    row_b = 2 * 128 * (4 * cout + 4 * cout)             # z in, out (dbl-buf)
    cap_a = max(8, (budget // row_a) // 8 * 8)
    cap_b = max(8, (budget // row_b) // 8 * 8)
    s_min = -(-hw // 128)
    if s_min <= cap_a:
        s_rows, ts_a = s_min, s_min
    else:
        ts_a = cap_a
        s_rows = -(-s_min // ts_a) * ts_a
    ts_b = _pick_tile(s_rows, cap_b, 8)
    return s_rows, ts_a, ts_b


# ---------------------------------------------------------------------------
# In-kernel math: erf-based GELU (A&S 7.1.26, |err| <= 1.5e-7)
# ---------------------------------------------------------------------------
_ERF_P = 0.3275911
_ERF_A = (0.254829592, -0.284496736, 1.421413741, -1.453152027, 1.061405429)


def _erf(x):
    ax = jnp.abs(x)
    d = 1.0 + _ERF_P * ax
    # EUP reciprocal seed + one Newton step: divide stays off the VALU while the
    # relative error drops to ~1e-7 (approx-only rcp was ~1e-4).
    r = pl.reciprocal(d, approx=True)
    r = r * (2.0 - d * r)
    a1, a2, a3, a4, a5 = _ERF_A
    poly = r * (a1 + r * (a2 + r * (a3 + r * (a4 + r * a5))))
    y = 1.0 - poly * jnp.exp(-(x * x))
    return jnp.where(x >= 0.0, y, -y)


def _gelu_exact(x):
    return (0.5 * x) * (1.0 + _erf(x * _SQRT1_2))


# ---------------------------------------------------------------------------
# Kernel 1: spectral (Fourier-mode) complex channel mixing on the VPU.
#   out[b, co, m] = sum_ci x[b, ci, m] * w[ci, co, m]   (complex)
# Gauss 3-multiply product with (wr+wi), (wi-wr) precomputed in the wrapper.
# ---------------------------------------------------------------------------
def _make_spectral_kernel(n_in):
    def kernel(xr_ref, xi_ref, wr_ref, ws_ref, wd_ref, or_ref, oi_ref):
        xr = xr_ref[...].astype(jnp.float32)        # (B, Cin, TM)
        xi = xi_ref[...].astype(jnp.float32)
        xs = xr + xi
        wr = wr_ref[...].astype(jnp.float32)        # (Cin, Cout, TM)
        ws = ws_ref[...].astype(jnp.float32)
        wd = wd_ref[...].astype(jnp.float32)
        acc_r = jnp.zeros(or_ref.shape, jnp.float32)
        acc_i = jnp.zeros(oi_ref.shape, jnp.float32)
        for ci in range(n_in):                      # static unroll (Cin is small)
            k1 = xs[:, ci:ci + 1, :] * wr[ci][None, :, :]   # wr*(xr+xi)
            k2 = xr[:, ci:ci + 1, :] * wd[ci][None, :, :]   # xr*(wi-wr)
            k3 = xi[:, ci:ci + 1, :] * ws[ci][None, :, :]   # xi*(wr+wi)
            acc_r = acc_r + (k1 - k3)
            acc_i = acc_i + (k1 + k2)
        or_ref[...] = acc_r
        oi_ref[...] = acc_i
    return kernel


def spectral_mul(xr, xi, wr, ws, wd):
    B, Cin, Mpad = xr.shape
    Cout = wr.shape[1]
    # Working set is tiny for typical mode counts: run the whole mode axis in
    # one (or very few) grid steps instead of many 512-lane tiles.
    row = 2 * 4 * (2 * B * Cin + 3 * Cin * Cout + 2 * B * Cout)
    cap = max(128, (_per_step_budget_bytes() // row) // 128 * 128)
    TM = _pick_tile(Mpad, cap, 128)
    flops = int(8 * B * Cin * Cout * Mpad)
    bytes_accessed = int(4 * Mpad * (2 * B * Cin + 3 * Cin * Cout + 2 * B * Cout))
    return pl.pallas_call(
        _make_spectral_kernel(Cin),
        out_shape=(jax.ShapeDtypeStruct((B, Cout, Mpad), jnp.float32),
                   jax.ShapeDtypeStruct((B, Cout, Mpad), jnp.float32)),
        grid=(Mpad // TM,),
        in_specs=[
            pl.BlockSpec((B, Cin, TM), lambda t: (0, 0, t)),
            pl.BlockSpec((B, Cin, TM), lambda t: (0, 0, t)),
            pl.BlockSpec((Cin, Cout, TM), lambda t: (0, 0, t)),
            pl.BlockSpec((Cin, Cout, TM), lambda t: (0, 0, t)),
            pl.BlockSpec((Cin, Cout, TM), lambda t: (0, 0, t)),
        ],
        out_specs=(
            pl.BlockSpec((B, Cout, TM), lambda t: (0, 0, t)),
            pl.BlockSpec((B, Cout, TM), lambda t: (0, 0, t)),
        ),
        compiler_params=pltpu.CompilerParams(
            dimension_semantics=("parallel",),
            vmem_limit_bytes=_vmem_limit_bytes()),
        cost_estimate=pl.CostEstimate(flops=flops, transcendentals=0,
                                      bytes_accessed=bytes_accessed),
    )(xr, xi, wr, ws, wd)


# ---------------------------------------------------------------------------
# Kernel 2 (pass A): 1x1 conv (unrolled VPU madd over Cin, scalar weights from
# SMEM) + residual add, streamed over full-vreg pixel tiles (rows, 128), with
# per-channel sum / sum-of-squares accumulated in lane-dense, VMEM-resident
# output blocks (init at first pixel step, written back at batch boundary).
# ---------------------------------------------------------------------------
def _make_conv_res_stats_kernel(cin, cout):
    def kernel(x_ref, w_ref, yf_ref, z_ref, s1_ref, s2_ref):
        pi = pl.program_id(1)

        @pl.when(pi == 0)
        def _():
            s1_ref[...] = jnp.zeros_like(s1_ref)
            s2_ref[...] = jnp.zeros_like(s2_ref)

        for co in range(cout):                                   # static unroll
            z = yf_ref[0, co].astype(jnp.float32)                # (TS, 128)
            for ci in range(cin):
                z = z + w_ref[co, ci] * x_ref[0, ci].astype(jnp.float32)
            z_ref[0, co] = z
            s1_ref[0, co:co + 1, :] += jnp.sum(z, axis=0, keepdims=True)
            s2_ref[0, co:co + 1, :] += jnp.sum(z * z, axis=0, keepdims=True)
    return kernel


def conv_residual_stats(x4, w, yf4, ts):
    B, Cin, S, _ = x4.shape
    Cout = w.shape[0]
    nP = S // ts
    bpe = 2 if x4.dtype == jnp.bfloat16 else 4
    flops = int(B * S * 128 * Cout * (2 * Cin + 5))
    bytes_accessed = int(S * 128 * B * (bpe * (Cin + Cout) + 4 * Cout)
                         + 4 * (w.size + 2 * B * Cout * 128))
    return pl.pallas_call(
        _make_conv_res_stats_kernel(Cin, Cout),
        out_shape=(jax.ShapeDtypeStruct((B, Cout, S, 128), jnp.float32),
                   jax.ShapeDtypeStruct((B, Cout, 128), jnp.float32),
                   jax.ShapeDtypeStruct((B, Cout, 128), jnp.float32)),
        grid=(B, nP),
        in_specs=[
            pl.BlockSpec((1, Cin, ts, 128), lambda bi, pi: (bi, 0, pi, 0)),
            pl.BlockSpec(memory_space=pltpu.MemorySpace.SMEM),   # (Cout, Cin) scalars
            pl.BlockSpec((1, Cout, ts, 128), lambda bi, pi: (bi, 0, pi, 0)),
        ],
        out_specs=(
            pl.BlockSpec((1, Cout, ts, 128), lambda bi, pi: (bi, 0, pi, 0)),
            pl.BlockSpec((1, Cout, 128), lambda bi, pi: (bi, 0, 0)),
            pl.BlockSpec((1, Cout, 128), lambda bi, pi: (bi, 0, 0)),
        ),
        compiler_params=pltpu.CompilerParams(
            dimension_semantics=("parallel", "arbitrary"),
            vmem_limit_bytes=_vmem_limit_bytes()),
        cost_estimate=pl.CostEstimate(flops=flops, transcendentals=0,
                                      bytes_accessed=bytes_accessed),
    )(x4, w, yf4)


# ---------------------------------------------------------------------------
# Kernel 3 (pass B): per-channel affine (folded BatchNorm) + GELU over
# full-vreg pixel tiles; scale/shift are per-channel scalars from SMEM.
# ---------------------------------------------------------------------------
def _make_bn_gelu_kernel(cout):
    def kernel(z_ref, sc_ref, sh_ref, o_ref):
        for co in range(cout):                                   # static unroll
            z = z_ref[0, co]                                     # (TS, 128)
            o_ref[0, co] = _gelu_exact(z * sc_ref[co] + sh_ref[co])
    return kernel


def bn_gelu(z4, scale, shift, ts):
    B, Cout, S, _ = z4.shape
    nP = S // ts
    n_el = B * S * 128 * Cout
    return pl.pallas_call(
        _make_bn_gelu_kernel(Cout),
        out_shape=jax.ShapeDtypeStruct((B, Cout, S, 128), jnp.float32),
        grid=(B, nP),
        in_specs=[
            pl.BlockSpec((1, Cout, ts, 128), lambda bi, pi: (bi, 0, pi, 0)),
            pl.BlockSpec(memory_space=pltpu.MemorySpace.SMEM),   # (Cout,) scale
            pl.BlockSpec(memory_space=pltpu.MemorySpace.SMEM),   # (Cout,) shift
        ],
        out_specs=pl.BlockSpec((1, Cout, ts, 128), lambda bi, pi: (bi, 0, pi, 0)),
        compiler_params=pltpu.CompilerParams(
            dimension_semantics=("parallel", "parallel"),
            vmem_limit_bytes=_vmem_limit_bytes()),
        cost_estimate=pl.CostEstimate(flops=int(22 * n_el),
                                      transcendentals=int(2 * n_el),
                                      bytes_accessed=int(8 * n_el)),
    )(z4, scale, shift)


# ---------------------------------------------------------------------------
# Full FNO2dBlock forward (FFT + tiny O(C) reductions in plain JAX).
# ---------------------------------------------------------------------------
def fno2d_block_forward(x, params, n_modes):
    B, Cin, H, W = x.shape
    m1, m2 = n_modes
    Wf = W // 2 + 1
    assert 2 * m1 <= H and m2 <= Wf, "retained modes exceed the spectrum"
    Cout = params["conv_w"].shape[0]
    HW = H * W
    M = 2 * m1 * m2
    Mpad = params["fno_wr"].shape[-1]

    # ---- FNOConv2d spectral branch ----
    # TODO(synk): rfft2 / irfft2 have no Pallas equivalent; they stay in plain JAX.
    x_ft = jnp.fft.rfft2(x, axes=(-2, -1))                          # (B,Cin,H,Wf) c64
    modes = jnp.concatenate(
        [x_ft[:, :, :m1, :m2], x_ft[:, :, H - m1:, :m2]], axis=2)    # (B,Cin,2m1,m2)
    xm = modes.reshape(B, Cin, M)
    xm_r = jnp.pad(jnp.real(xm).astype(jnp.float32), ((0, 0), (0, 0), (0, Mpad - M)))
    xm_i = jnp.pad(jnp.imag(xm).astype(jnp.float32), ((0, 0), (0, 0), (0, Mpad - M)))

    wr = params["fno_wr"]
    wi = params["fno_wi"]
    ws = wr + wi                       # Gauss 3-mult: host-side weight combos
    wd = wi - wr
    o_r, o_i = spectral_mul(xm_r, xm_i, wr, ws, wd)

    om = (o_r[:, :, :M] + 1j * o_i[:, :, :M]).reshape(B, Cout, 2 * m1, m2)
    top = jnp.pad(om[:, :, :m1], ((0, 0), (0, 0), (0, 0), (0, Wf - m2)))
    bot = jnp.pad(om[:, :, m1:], ((0, 0), (0, 0), (0, 0), (0, Wf - m2)))
    mid = jnp.zeros((B, Cout, H - 2 * m1, Wf), dtype=om.dtype)
    out_ft = jnp.concatenate([top, mid, bot], axis=2)                # no scatter
    y_fno = jnp.fft.irfft2(out_ft, s=(H, W), axes=(-2, -1)).astype(jnp.float32)

    # ---- 1x1 conv + residual + BatchNorm(batch stats) + GELU ----
    # NCHW throughout; pixels packed as (rows, 128) so every vreg is full even
    # when C < 8.  (B,C,H,W)->(B,C,HW)->(B,C,rows,128) are free reshapes.
    S, tsA, tsB = _plan_pixel_tiling(HW, Cin, Cout)
    HWp = S * 128
    x3 = x.reshape(B, Cin, HW)
    yf3 = y_fno.reshape(B, Cout, HW)
    if HWp != HW:
        pad = ((0, 0), (0, 0), (0, HWp - HW))
        x3 = jnp.pad(x3, pad)
        yf3 = jnp.pad(yf3, pad)
    x4 = x3.reshape(B, Cin, S, 128)
    yf4 = yf3.reshape(B, Cout, S, 128)
    if USE_BF16_STREAMS:
        x4 = x4.astype(jnp.bfloat16)
        yf4 = yf4.astype(jnp.bfloat16)

    # Conv bias is intentionally NOT added: a per-channel constant before
    # training-mode BatchNorm is exactly cancelled by the batch-mean
    # subtraction, so the block output is mathematically identical.
    z4, s1, s2 = conv_residual_stats(x4, params["conv_w"], yf4, tsA)

    # Padded tail pixels are exactly zero (zero x, zero y_fno, no bias), so they
    # add 0 to both sums; divide by the true pixel count.
    cnt = jnp.float32(B * HW)
    mean = jnp.sum(s1, axis=(0, 2)) / cnt                           # (Cout,)
    # TODO(synk): E[z^2]-E[z]^2 can cancel when |mean| >> std; a Welford-style
    # second pass would be needed for extreme statistics.
    var = jnp.sum(s2, axis=(0, 2)) / cnt - mean * mean              # biased variance
    inv = jax.lax.rsqrt(var + _EPS)
    scale = params["bn_gamma"] * inv
    shift = params["bn_beta"] - params["bn_gamma"] * mean * inv

    out4 = bn_gelu(z4, scale, shift, tsB)
    out3 = out4.reshape(B, Cout, HWp)[:, :, :HW]
    return out3.reshape(B, Cout, H, W)                              # already NCHW


# ---------------------------------------------------------------------------
# Deterministic parameter init (shapes per the module's __init__)
# ---------------------------------------------------------------------------
def init_params(key, in_channels, out_channels, n_modes):
    m1, m2 = n_modes
    M = 2 * m1 * m2
    Mpad = ((M + 127) // 128) * 128
    k1, k2, k3, k4 = jax.random.split(key, 4)
    # FNOConv2d: two complex weights (Cin, Cout, m1, m2), scale = 1/(Cin*Cout),
    # real/imag ~ U[0,1).  Stacked along the mode-row axis then flattened onto
    # the lane axis: (Cin, Cout, Mpad).
    scale = 1.0 / (in_channels * out_channels)
    wr = scale * jax.random.uniform(k1, (in_channels, out_channels, 2 * m1, m2), jnp.float32)
    wi = scale * jax.random.uniform(k2, (in_channels, out_channels, 2 * m1, m2), jnp.float32)
    fno_wr = jnp.pad(wr.reshape(in_channels, out_channels, M),
                     ((0, 0), (0, 0), (0, Mpad - M)))
    fno_wi = jnp.pad(wi.reshape(in_channels, out_channels, M),
                     ((0, 0), (0, 0), (0, Mpad - M)))
    # Conv2d(in, out, kernel_size=1): PyTorch weight (Cout, Cin, 1, 1) maps to
    # this (Cout, Cin) layout via weight[:, :, 0, 0].  The bias is kept for
    # fidelity but unused in forward (cancelled by training-mode BN).
    bound = 1.0 / (in_channels ** 0.5)
    conv_w = jax.random.uniform(k3, (out_channels, in_channels), jnp.float32, -bound, bound)
    conv_b = jax.random.uniform(k4, (out_channels,), jnp.float32, -bound, bound)
    bn_gamma = jnp.ones((out_channels,), jnp.float32)
    bn_beta = jnp.zeros((out_channels,), jnp.float32)
    return dict(fno_wr=fno_wr, fno_wi=fno_wi, conv_w=conv_w, conv_b=conv_b,
                bn_gamma=bn_gamma, bn_beta=bn_beta)


if __name__ == "__main__":
    B, Cin, Cout, H, W = 2, 4, 4, 16, 16
    n_modes = (4, 4)

    key = jax.random.PRNGKey(0)
    kx, kp = jax.random.split(key)
    x = jax.random.normal(kx, (B, Cin, H, W), jnp.float32)
    params = init_params(kp, Cin, Cout, n_modes)

    fwd = jax.jit(functools.partial(fno2d_block_forward, n_modes=n_modes))
    out = fwd(x, params)
    jax.block_until_ready(out)

    assert out.shape == (B, Cout, H, W), out.shape
    assert out.dtype == jnp.float32
    assert bool(jnp.all(jnp.isfinite(out)))
    print("KERNEL_OK")
</pallas_src>

<mosaic_0001>
module attributes {stable_mosaic.version = 11 : i64} {
  func.func @kernel(%arg0: i32, %arg1: memref<2x4x128xf32, #tpu.memory_space<vmem>>, %arg2: memref<2x4x128xf32, #tpu.memory_space<vmem>>, %arg3: memref<4x4x128xf32, #tpu.memory_space<vmem>>, %arg4: memref<4x4x128xf32, #tpu.memory_space<vmem>>, %arg5: memref<4x4x128xf32, #tpu.memory_space<vmem>>, %arg6: memref<2x4x128xf32, #tpu.memory_space<vmem>>, %arg7: memref<2x4x128xf32, #tpu.memory_space<vmem>>) attributes {dimension_semantics = [#tpu.dimension_semantics<parallel>], iteration_bounds = array<i64: 1>, scalar_prefetch = 0 : i64, scratch_operands = 0 : i64, tpu.core_type = #tpu.core_type<tc>, window_params = [{transform_indices = @transform_0, window_bounds = array<i64: 2, 4, 128>}, {transform_indices = @transform_1, window_bounds = array<i64: 2, 4, 128>}, {transform_indices = @transform_2, window_bounds = array<i64: 4, 4, 128>}, {transform_indices = @transform_3, window_bounds = array<i64: 4, 4, 128>}, {transform_indices = @transform_4, window_bounds = array<i64: 4, 4, 128>}, {transform_indices = @transform_5, window_bounds = array<i64: 2, 4, 128>}, {transform_indices = @transform_6, window_bounds = array<i64: 2, 4, 128>}]} {
    %c0 = arith.constant 0 : index
    %c0_0 = arith.constant 0 : index
    %c0_1 = arith.constant 0 : index
    %0 = vector.load %arg1[%c0, %c0_0, %c0_1] : memref<2x4x128xf32, #tpu.memory_space<vmem>>, vector<2x4x128xf32>
    %c0_2 = arith.constant 0 : index
    %c0_3 = arith.constant 0 : index
    %c0_4 = arith.constant 0 : index
    %1 = vector.load %arg2[%c0_2, %c0_3, %c0_4] : memref<2x4x128xf32, #tpu.memory_space<vmem>>, vector<2x4x128xf32>
    %2 = arith.addf %0, %1 : vector<2x4x128xf32>
    %c0_5 = arith.constant 0 : index
    %c0_6 = arith.constant 0 : index
    %c0_7 = arith.constant 0 : index
    %3 = vector.load %arg3[%c0_5, %c0_6, %c0_7] : memref<4x4x128xf32, #tpu.memory_space<vmem>>, vector<4x4x128xf32>
    %c0_8 = arith.constant 0 : index
    %c0_9 = arith.constant 0 : index
    %c0_10 = arith.constant 0 : index
    %4 = vector.load %arg4[%c0_8, %c0_9, %c0_10] : memref<4x4x128xf32, #tpu.memory_space<vmem>>, vector<4x4x128xf32>
    %c0_11 = arith.constant 0 : index
    %c0_12 = arith.constant 0 : index
    %c0_13 = arith.constant 0 : index
    %5 = vector.load %arg5[%c0_11, %c0_12, %c0_13] : memref<4x4x128xf32, #tpu.memory_space<vmem>>, vector<4x4x128xf32>
    %cst = arith.constant 0.000000e+00 : f32
    %6 = vector.broadcast %cst : f32 to vector<2x4x128xf32>
    %cst_14 = arith.constant 0.000000e+00 : f32
    %7 = vector.broadcast %cst_14 : f32 to vector<2x4x128xf32>
    %8 = vector.extract_strided_slice %2 {offsets = [0, 0, 0], sizes = [2, 1, 128], strides = [1, 1, 1]} : vector<2x4x128xf32> to vector<2x1x128xf32>
    %9 = vector.extract_strided_slice %3 {offsets = [0, 0, 0], sizes = [1, 4, 128], strides = [1, 1, 1]} : vector<4x4x128xf32> to vector<1x4x128xf32>
    %10 = vector.shape_cast %9 : vector<1x4x128xf32> to vector<4x128xf32>
    %11 = vector.shape_cast %10 : vector<4x128xf32> to vector<1x4x128xf32>
    %12 = vector.broadcast %8 : vector<2x1x128xf32> to vector<2x4x128xf32>
    %13 = vector.broadcast %11 : vector<1x4x128xf32> to vector<2x4x128xf32>
    %14 = arith.mulf %12, %13 : vector<2x4x128xf32>
    %15 = vector.extract_strided_slice %0 {offsets = [0, 0, 0], sizes = [2, 1, 128], strides = [1, 1, 1]} : vector<2x4x128xf32> to vector<2x1x128xf32>
    %16 = vector.extract_strided_slice %5 {offsets = [0, 0, 0], sizes = [1, 4, 128], strides = [1, 1, 1]} : vector<4x4x128xf32> to vector<1x4x128xf32>
    %17 = vector.shape_cast %16 : vector<1x4x128xf32> to vector<4x128xf32>
    %18 = vector.shape_cast %17 : vector<4x128xf32> to vector<1x4x128xf32>
    %19 = vector.broadcast %15 : vector<2x1x128xf32> to vector<2x4x128xf32>
    %20 = vector.broadcast %18 : vector<1x4x128xf32> to vector<2x4x128xf32>
    %21 = arith.mulf %19, %20 : vector<2x4x128xf32>
    %22 = vector.extract_strided_slice %1 {offsets = [0, 0, 0], sizes = [2, 1, 128], strides = [1, 1, 1]} : vector<2x4x128xf32> to vector<2x1x128xf32>
    %23 = vector.extract_strided_slice %4 {offsets = [0, 0, 0], sizes = [1, 4, 128], strides = [1, 1, 1]} : vector<4x4x128xf32> to vector<1x4x128xf32>
    %24 = vector.shape_cast %23 : vector<1x4x128xf32> to vector<4x128xf32>
    %25 = vector.shape_cast %24 : vector<4x128xf32> to vector<1x4x128xf32>
    %26 = vector.broadcast %22 : vector<2x1x128xf32> to vector<2x4x128xf32>
    %27 = vector.broadcast %25 : vector<1x4x128xf32> to vector<2x4x128xf32>
    %28 = arith.mulf %26, %27 : vector<2x4x128xf32>
    %29 = arith.subf %14, %28 : vector<2x4x128xf32>
    %30 = arith.addf %6, %29 : vector<2x4x128xf32>
    %31 = arith.addf %14, %21 : vector<2x4x128xf32>
    %32 = arith.addf %7, %31 : vector<2x4x128xf32>
    %33 = vector.extract_strided_slice %2 {offsets = [0, 1, 0], sizes = [2, 1, 128], strides = [1, 1, 1]} : vector<2x4x128xf32> to vector<2x1x128xf32>
    %34 = vector.extract_strided_slice %3 {offsets = [1, 0, 0], sizes = [1, 4, 128], strides = [1, 1, 1]} : vector<4x4x128xf32> to vector<1x4x128xf32>
    %35 = vector.shape_cast %34 : vector<1x4x128xf32> to vector<4x128xf32>
    %36 = vector.shape_cast %35 : vector<4x128xf32> to vector<1x4x128xf32>
    %37 = vector.broadcast %33 : vector<2x1x128xf32> to vector<2x4x128xf32>
    %38 = vector.broadcast %36 : vector<1x4x128xf32> to vector<2x4x128xf32>
    %39 = arith.mulf %37, %38 : vector<2x4x128xf32>
    %40 = vector.extract_strided_slice %0 {offsets = [0, 1, 0], sizes = [2, 1, 128], strides = [1, 1, 1]} : vector<2x4x128xf32> to vector<2x1x128xf32>
    %41 = vector.extract_strided_slice %5 {offsets = [1, 0, 0], sizes = [1, 4, 128], strides = [1, 1, 1]} : vector<4x4x128xf32> to vector<1x4x128xf32>
    %42 = vector.shape_cast %41 : vector<1x4x128xf32> to vector<4x128xf32>
    %43 = vector.shape_cast %42 : vector<4x128xf32> to vector<1x4x128xf32>
    %44 = vector.broadcast %40 : vector<2x1x128xf32> to vector<2x4x128xf32>
    %45 = vector.broadcast %43 : vector<1x4x128xf32> to vector<2x4x128xf32>
    %46 = arith.mulf %44, %45 : vector<2x4x128xf32>
    %47 = vector.extract_strided_slice %1 {offsets = [0, 1, 0], sizes = [2, 1, 128], strides = [1, 1, 1]} : vector<2x4x128xf32> to vector<2x1x128xf32>
    %48 = vector.extract_strided_slice %4 {offsets = [1, 0, 0], sizes = [1, 4, 128], strides = [1, 1, 1]} : vector<4x4x128xf32> to vector<1x4x128xf32>
    %49 = vector.shape_cast %48 : vector<1x4x128xf32> to vector<4x128xf32>
    %50 = vector.shape_cast %49 : vector<4x128xf32> to vector<1x4x128xf32>
    %51 = vector.broadcast %47 : vector<2x1x128xf32> to vector<2x4x128xf32>
    %52 = vector.broadcast %50 : vector<1x4x128xf32> to vector<2x4x128xf32>
    %53 = arith.mulf %51, %52 : vector<2x4x128xf32>
    %54 = arith.subf %39, %53 : vector<2x4x128xf32>
    %55 = arith.addf %30, %54 : vector<2x4x128xf32>
    %56 = arith.addf %39, %46 : vector<2x4x128xf32>
    %57 = arith.addf %32, %56 : vector<2x4x128xf32>
    %58 = vector.extract_strided_slice %2 {offsets = [0, 2, 0], sizes = [2, 1, 128], strides = [1, 1, 1]} : vector<2x4x128xf32> to vector<2x1x128xf32>
    %59 = vector.extract_strided_slice %3 {offsets = [2, 0, 0], sizes = [1, 4, 128], strides = [1, 1, 1]} : vector<4x4x128xf32> to vector<1x4x128xf32>
    %60 = vector.shape_cast %59 : vector<1x4x128xf32> to vector<4x128xf32>
    %61 = vector.shape_cast %60 : vector<4x128xf32> to vector<1x4x128xf32>
    %62 = vector.broadcast %58 : vector<2x1x128xf32> to vector<2x4x128xf32>
    %63 = vector.broadcast %61 : vector<1x4x128xf32> to vector<2x4x128xf32>
    %64 = arith.mulf %62, %63 : vector<2x4x128xf32>
    %65 = vector.extract_strided_slice %0 {offsets = [0, 2, 0], sizes = [2, 1, 128], strides = [1, 1, 1]} : vector<2x4x128xf32> to vector<2x1x128xf32>
    %66 = vector.extract_strided_slice %5 {offsets = [2, 0, 0], sizes = [1, 4, 128], strides = [1, 1, 1]} : vector<4x4x128xf32> to vector<1x4x128xf32>
    %67 = vector.shape_cast %66 : vector<1x4x128xf32> to vector<4x128xf32>
    %68 = vector.shape_cast %67 : vector<4x128xf32> to vector<1x4x128xf32>
    %69 = vector.broadcast %65 : vector<2x1x128xf32> to vector<2x4x128xf32>
    %70 = vector.broadcast %68 : vector<1x4x128xf32> to vector<2x4x128xf32>
    %71 = arith.mulf %69, %70 : vector<2x4x128xf32>
    %72 = vector.extract_strided_slice %1 {offsets = [0, 2, 0], sizes = [2, 1, 128], strides = [1, 1, 1]} : vector<2x4x128xf32> to vector<2x1x128xf32>
    %73 = vector.extract_strided_slice %4 {offsets = [2, 0, 0], sizes = [1, 4, 128], strides = [1, 1, 1]} : vector<4x4x128xf32> to vector<1x4x128xf32>
    %74 = vector.shape_cast %73 : vector<1x4x128xf32> to vector<4x128xf32>
    %75 = vector.shape_cast %74 : vector<4x128xf32> to vector<1x4x128xf32>
    %76 = vector.broadcast %72 : vector<2x1x128xf32> to vector<2x4x128xf32>
    %77 = vector.broadcast %75 : vector<1x4x128xf32> to vector<2x4x128xf32>
    %78 = arith.mulf %76, %77 : vector<2x4x128xf32>
    %79 = arith.subf %64, %78 : vector<2x4x128xf32>
    %80 = arith.addf %55, %79 : vector<2x4x128xf32>
    %81 = arith.addf %64, %71 : vector<2x4x128xf32>
    %82 = arith.addf %57, %81 : vector<2x4x128xf32>
    %83 = vector.extract_strided_slice %2 {offsets = [0, 3, 0], sizes = [2, 1, 128], strides = [1, 1, 1]} : vector<2x4x128xf32> to vector<2x1x128xf32>
    %84 = vector.extract_strided_slice %3 {offsets = [3, 0, 0], sizes = [1, 4, 128], strides = [1, 1, 1]} : vector<4x4x128xf32> to vector<1x4x128xf32>
    %85 = vector.shape_cast %84 : vector<1x4x128xf32> to vector<4x128xf32>
    %86 = vector.shape_cast %85 : vector<4x128xf32> to vector<1x4x128xf32>
    %87 = vector.broadcast %83 : vector<2x1x128xf32> to vector<2x4x128xf32>
    %88 = vector.broadcast %86 : vector<1x4x128xf32> to vector<2x4x128xf32>
    %89 = arith.mulf %87, %88 : vector<2x4x128xf32>
    %90 = vector.extract_strided_slice %0 {offsets = [0, 3, 0], sizes = [2, 1, 128], strides = [1, 1, 1]} : vector<2x4x128xf32> to vector<2x1x128xf32>
    %91 = vector.extract_strided_slice %5 {offsets = [3, 0, 0], sizes = [1, 4, 128], strides = [1, 1, 1]} : vector<4x4x128xf32> to vector<1x4x128xf32>
    %92 = vector.shape_cast %91 : vector<1x4x128xf32> to vector<4x128xf32>
    %93 = vector.shape_cast %92 : vector<4x128xf32> to vector<1x4x128xf32>
    %94 = vector.broadcast %90 : vector<2x1x128xf32> to vector<2x4x128xf32>
    %95 = vector.broadcast %93 : vector<1x4x128xf32> to vector<2x4x128xf32>
    %96 = arith.mulf %94, %95 : vector<2x4x128xf32>
    %97 = vector.extract_strided_slice %1 {offsets = [0, 3, 0], sizes = [2, 1, 128], strides = [1, 1, 1]} : vector<2x4x128xf32> to vector<2x1x128xf32>
    %98 = vector.extract_strided_slice %4 {offsets = [3, 0, 0], sizes = [1, 4, 128], strides = [1, 1, 1]} : vector<4x4x128xf32> to vector<1x4x128xf32>
    %99 = vector.shape_cast %98 : vector<1x4x128xf32> to vector<4x128xf32>
    %100 = vector.shape_cast %99 : vector<4x128xf32> to vector<1x4x128xf32>
    %101 = vector.broadcast %97 : vector<2x1x128xf32> to vector<2x4x128xf32>
    %102 = vector.broadcast %100 : vector<1x4x128xf32> to vector<2x4x128xf32>
    %103 = arith.mulf %101, %102 : vector<2x4x128xf32>
    %104 = arith.subf %89, %103 : vector<2x4x128xf32>
    %105 = arith.addf %80, %104 : vector<2x4x128xf32>
    %106 = arith.addf %89, %96 : vector<2x4x128xf32>
    %107 = arith.addf %82, %106 : vector<2x4x128xf32>
    %c0_15 = arith.constant 0 : index
    %c0_16 = arith.constant 0 : index
    %c0_17 = arith.constant 0 : index
    %108 = vector.load %arg6[%c0_15, %c0_16, %c0_17] : memref<2x4x128xf32, #tpu.memory_space<vmem>>, vector<2x4x128xf32>
    tpu.vector_store %arg6[%c0_15, %c0_16, %c0_17], %105 {strides = array<i32>} : memref<2x4x128xf32, #tpu.memory_space<vmem>>, vector<2x4x128xf32>,
    %c0_18 = arith.constant 0 : index
    %c0_19 = arith.constant 0 : index
    %c0_20 = arith.constant 0 : index
    %109 = vector.load %arg7[%c0_18, %c0_19, %c0_20] : memref<2x4x128xf32, #tpu.memory_space<vmem>>, vector<2x4x128xf32>
    tpu.vector_store %arg7[%c0_18, %c0_19, %c0_20], %107 {strides = array<i32>} : memref<2x4x128xf32, #tpu.memory_space<vmem>>, vector<2x4x128xf32>,
    return
  }
  func.func @transform_0(%arg0: i32) -> (i32, i32, i32) {
    %c0_i32 = arith.constant 0 : i32
    %c0_i32_0 = arith.constant 0 : i32
    %c0_i32_1 = arith.constant 0 : i32
    return %c0_i32, %c0_i32_0, %arg0 : i32, i32, i32
  }
  func.func @transform_1(%arg0: i32) -> (i32, i32, i32) {
    %c0_i32 = arith.constant 0 : i32
    %c0_i32_0 = arith.constant 0 : i32
    %c0_i32_1 = arith.constant 0 : i32
    return %c0_i32, %c0_i32_0, %arg0 : i32, i32, i32
  }
  func.func @transform_2(%arg0: i32) -> (i32, i32, i32) {
    %c0_i32 = arith.constant 0 : i32
    %c0_i32_0 = arith.constant 0 : i32
    %c0_i32_1 = arith.constant 0 : i32
    return %c0_i32, %c0_i32_0, %arg0 : i32, i32, i32
  }
  func.func @transform_3(%arg0: i32) -> (i32, i32, i32) {
    %c0_i32 = arith.constant 0 : i32
    %c0_i32_0 = arith.constant 0 : i32
    %c0_i32_1 = arith.constant 0 : i32
    return %c0_i32, %c0_i32_0, %arg0 : i32, i32, i32
  }
  func.func @transform_4(%arg0: i32) -> (i32, i32, i32) {
    %c0_i32 = arith.constant 0 : i32
    %c0_i32_0 = arith.constant 0 : i32
    %c0_i32_1 = arith.constant 0 : i32
    return %c0_i32, %c0_i32_0, %arg0 : i32, i32, i32
  }
  func.func @transform_5(%arg0: i32) -> (i32, i32, i32) {
    %c0_i32 = arith.constant 0 : i32
    %c0_i32_0 = arith.constant 0 : i32
    %c0_i32_1 = arith.constant 0 : i32
    return %c0_i32, %c0_i32_0, %arg0 : i32, i32, i32
  }
  func.func @transform_6(%arg0: i32) -> (i32, i32, i32) {
    %c0_i32 = arith.constant 0 : i32
    %c0_i32_0 = arith.constant 0 : i32
    %c0_i32_1 = arith.constant 0 : i32
    return %c0_i32, %c0_i32_0, %arg0 : i32, i32, i32
  }
}

module attributes {stable_mosaic.version = 11 : i64} {
  func.func @kernel(%arg0: i32, %arg1: i32, %arg2: memref<1x4x2x128xf32, #tpu.memory_space<vmem>>, %arg3: memref<4x4xf32, #tpu.memory_space<smem>>, %arg4: memref<1x4x2x128xf32, #tpu.memory_space<vmem>>, %arg5: memref<1x4x2x128xf32, #tpu.memory_space<vmem>>, %arg6: memref<1x4x128xf32, #tpu.memory_space<vmem>>, %arg7: memref<1x4x128xf32, #tpu.memory_space<vmem>>) attributes {dimension_semantics = [#tpu.dimension_semantics<parallel>, #tpu.dimension_semantics<arbitrary>], iteration_bounds = array<i64: 2, 1>, scalar_prefetch = 0 : i64, scratch_operands = 0 : i64, tpu.core_type = #tpu.core_type<tc>, window_params = [{transform_indices = @transform_0, window_bounds = array<i64: 1, 4, 2, 128>}, {transform_indices = @transform_1, window_bounds = array<i64: 4, 4>}, {transform_indices = @transform_2, window_bounds = array<i64: 1, 4, 2, 128>}, {transform_indices = @transform_3, window_bounds = array<i64: 1, 4, 2, 128>}, {transform_indices = @transform_4, window_bounds = array<i64: 1, 4, 128>}, {transform_indices = @transform_5, window_bounds = array<i64: 1, 4, 128>}]} {
    %c0_i32 = arith.constant 0 : i32
    %0 = arith.cmpi eq, %arg1, %c0_i32 : i32
    %1 = arith.extui %0 : i1 to i32
    %c0_i32_0 = arith.constant 0 : i32
    %2 = arith.cmpi ne, %1, %c0_i32_0 : i32
    scf.if %2 {
      %cst_180 = arith.constant 0.000000e+00 : f32
      %187 = vector.broadcast %cst_180 : f32 to vector<1x4x128xf32>
      %c0_181 = arith.constant 0 : index
      %c0_182 = arith.constant 0 : index
      %c0_183 = arith.constant 0 : index
      %188 = vector.load %arg6[%c0_181, %c0_182, %c0_183] : memref<1x4x128xf32, #tpu.memory_space<vmem>>, vector<1x4x128xf32>
      tpu.vector_store %arg6[%c0_181, %c0_182, %c0_183], %187 {strides = array<i32>} : memref<1x4x128xf32, #tpu.memory_space<vmem>>, vector<1x4x128xf32>,
      %cst_184 = arith.constant 0.000000e+00 : f32
      %189 = vector.broadcast %cst_184 : f32 to vector<1x4x128xf32>
      %c0_185 = arith.constant 0 : index
      %c0_186 = arith.constant 0 : index
      %c0_187 = arith.constant 0 : index
      %190 = vector.load %arg7[%c0_185, %c0_186, %c0_187] : memref<1x4x128xf32, #tpu.memory_space<vmem>>, vector<1x4x128xf32>
      tpu.vector_store %arg7[%c0_185, %c0_186, %c0_187], %189 {strides = array<i32>} : memref<1x4x128xf32, #tpu.memory_space<vmem>>, vector<1x4x128xf32>,
    } else {
    }
    %c0 = arith.constant 0 : index
    %c0_1 = arith.constant 0 : index
    %c0_2 = arith.constant 0 : index
    %c0_3 = arith.constant 0 : index
    %3 = vector.load %arg4[%c0, %c0_1, %c0_2, %c0_3] : memref<1x4x2x128xf32, #tpu.memory_space<vmem>>, vector<1x1x2x128xf32>
    %4 = vector.shape_cast %3 : vector<1x1x2x128xf32> to vector<2x128xf32>
    %c0_4 = arith.constant 0 : index
    %c0_5 = arith.constant 0 : index
    %5 = memref.load %arg3[%c0_4, %c0_5] : memref<4x4xf32, #tpu.memory_space<smem>>
    %c0_6 = arith.constant 0 : index
    %c0_7 = arith.constant 0 : index
    %c0_8 = arith.constant 0 : index
    %c0_9 = arith.constant 0 : index
    %6 = vector.load %arg2[%c0_6, %c0_7, %c0_8, %c0_9] : memref<1x4x2x128xf32, #tpu.memory_space<vmem>>, vector<1x1x2x128xf32>
    %7 = vector.shape_cast %6 : vector<1x1x2x128xf32> to vector<2x128xf32>
    %8 = vector.broadcast %5 : f32 to vector<2x128xf32>
    %9 = arith.mulf %8, %7 : vector<2x128xf32>
    %10 = arith.addf %4, %9 : vector<2x128xf32>
    %c0_10 = arith.constant 0 : index
    %c1 = arith.constant 1 : index
    %11 = memref.load %arg3[%c0_10, %c1] : memref<4x4xf32, #tpu.memory_space<smem>>
    %c0_11 = arith.constant 0 : index
    %c1_12 = arith.constant 1 : index
    %c0_13 = arith.constant 0 : index
    %c0_14 = arith.constant 0 : index
    %12 = vector.load %arg2[%c0_11, %c1_12, %c0_13, %c0_14] : memref<1x4x2x128xf32, #tpu.memory_space<vmem>>, vector<1x1x2x128xf32>
    %13 = vector.shape_cast %12 : vector<1x1x2x128xf32> to vector<2x128xf32>
    %14 = vector.broadcast %11 : f32 to vector<2x128xf32>
    %15 = arith.mulf %14, %13 : vector<2x128xf32>
    %16 = arith.addf %10, %15 : vector<2x128xf32>
    %c0_15 = arith.constant 0 : index
    %c2 = arith.constant 2 : index
    %17 = memref.load %arg3[%c0_15, %c2] : memref<4x4xf32, #tpu.memory_space<smem>>
    %c0_16 = arith.constant 0 : index
    %c2_17 = arith.constant 2 : index
    %c0_18 = arith.constant 0 : index
    %c0_19 = arith.constant 0 : index
    %18 = vector.load %arg2[%c0_16, %c2_17, %c0_18, %c0_19] : memref<1x4x2x128xf32, #tpu.memory_space<vmem>>, vector<1x1x2x128xf32>
    %19 = vector.shape_cast %18 : vector<1x1x2x128xf32> to vector<2x128xf32>
    %20 = vector.broadcast %17 : f32 to vector<2x128xf32>
    %21 = arith.mulf %20, %19 : vector<2x128xf32>
    %22 = arith.addf %16, %21 : vector<2x128xf32>
    %c0_20 = arith.constant 0 : index
    %c3 = arith.constant 3 : index
    %23 = memref.load %arg3[%c0_20, %c3] : memref<4x4xf32, #tpu.memory_space<smem>>
    %c0_21 = arith.constant 0 : index
    %c3_22 = arith.constant 3 : index
    %c0_23 = arith.constant 0 : index
    %c0_24 = arith.constant 0 : index
    %24 = vector.load %arg2[%c0_21, %c3_22, %c0_23, %c0_24] : memref<1x4x2x128xf32, #tpu.memory_space<vmem>>, vector<1x1x2x128xf32>
    %25 = vector.shape_cast %24 : vector<1x1x2x128xf32> to vector<2x128xf32>
    %26 = vector.broadcast %23 : f32 to vector<2x128xf32>
    %27 = arith.mulf %26, %25 : vector<2x128xf32>
    %28 = arith.addf %22, %27 : vector<2x128xf32>
    %c0_25 = arith.constant 0 : index
    %c0_26 = arith.constant 0 : index
    %c0_27 = arith.constant 0 : index
    %c0_28 = arith.constant 0 : index
    %29 = vector.load %arg5[%c0_25, %c0_26, %c0_27, %c0_28] : memref<1x4x2x128xf32, #tpu.memory_space<vmem>>, vector<1x1x2x128xf32>
    %30 = vector.shape_cast %29 : vector<1x1x2x128xf32> to vector<2x128xf32>
    %31 = vector.shape_cast %28 : vector<2x128xf32> to vector<1x1x2x128xf32>
    tpu.vector_store %arg5[%c0_25, %c0_26, %c0_27, %c0_28], %31 {strides = array<i32>} : memref<1x4x2x128xf32, #tpu.memory_space<vmem>>, vector<1x1x2x128xf32>,
    %c0_29 = arith.constant 0 : index
    %c0_30 = arith.constant 0 : index
    %c0_31 = arith.constant 0 : index
    %32 = vector.load %arg6[%c0_29, %c0_30, %c0_31] : memref<1x4x128xf32, #tpu.memory_space<vmem>>, vector<1x1x128xf32>
    %33 = vector.shape_cast %32 : vector<1x1x128xf32> to vector<1x128xf32>
    %cst = arith.constant dense<0.000000e+00> : vector<128xf32>
    %34 = vector.multi_reduction <add>, %28, %cst [0] : vector<2x128xf32> to vector<128xf32>
    %35 = vector.shape_cast %34 : vector<128xf32> to vector<1x128xf32>
    %36 = arith.addf %33, %35 : vector<1x128xf32>
    %c0_32 = arith.constant 0 : index
    %c0_33 = arith.constant 0 : index
    %c0_34 = arith.constant 0 : index
    %37 = vector.load %arg6[%c0_32, %c0_33, %c0_34] : memref<1x4x128xf32, #tpu.memory_space<vmem>>, vector<1x1x128xf32>
    %38 = vector.shape_cast %37 : vector<1x1x128xf32> to vector<1x128xf32>
    %39 = vector.shape_cast %36 : vector<1x128xf32> to vector<1x1x128xf32>
    tpu.vector_store %arg6[%c0_32, %c0_33, %c0_34], %39 {strides = array<i32>} : memref<1x4x128xf32, #tpu.memory_space<vmem>>, vector<1x1x128xf32>,
    %c0_35 = arith.constant 0 : index
    %c0_36 = arith.constant 0 : index
    %c0_37 = arith.constant 0 : index
    %40 = vector.load %arg7[%c0_35, %c0_36, %c0_37] : memref<1x4x128xf32, #tpu.memory_space<vmem>>, vector<1x1x128xf32>
    %41 = vector.shape_cast %40 : vector<1x1x128xf32> to vector<1x128xf32>
    %42 = arith.mulf %28, %28 : vector<2x128xf32>
    %cst_38 = arith.constant dense<0.000000e+00> : vector<128xf32>
    %43 = vector.multi_reduction <add>, %42, %cst_38 [0] : vector<2x128xf32> to vector<128xf32>
    %44 = vector.shape_cast %43 : vector<128xf32> to vector<1x128xf32>
    %45 = arith.addf %41, %44 : vector<1x128xf32>
    %c0_39 = arith.constant 0 : index
    %c0_40 = arith.constant 0 : index
    %c0_41 = arith.constant 0 : index
    %46 = vector.load %arg7[%c0_39, %c0_40, %c0_41] : memref<1x4x128xf32, #tpu.memory_space<vmem>>, vector<1x1x128xf32>
    %47 = vector.shape_cast %46 : vector<1x1x128xf32> to vector<1x128xf32>
    %48 = vector.shape_cast %45 : vector<1x128xf32> to vector<1x1x128xf32>
    tpu.vector_store %arg7[%c0_39, %c0_40, %c0_41], %48 {strides = array<i32>} : memref<1x4x128xf32, #tpu.memory_space<vmem>>, vector<1x1x128xf32>,
    %c0_42 = arith.constant 0 : index
    %c1_43 = arith.constant 1 : index
    %c0_44 = arith.constant 0 : index
    %c0_45 = arith.constant 0 : index
    %49 = vector.load %arg4[%c0_42, %c1_43, %c0_44, %c0_45] : memref<1x4x2x128xf32, #tpu.memory_space<vmem>>, vector<1x1x2x128xf32>
    %50 = vector.shape_cast %49 : vector<1x1x2x128xf32> to vector<2x128xf32>
    %c1_46 = arith.constant 1 : index
    %c0_47 = arith.constant 0 : index
    %51 = memref.load %arg3[%c1_46, %c0_47] : memref<4x4xf32, #tpu.memory_space<smem>>
    %c0_48 = arith.constant 0 : index
    %c0_49 = arith.constant 0 : index
    %c0_50 = arith.constant 0 : index
    %c0_51 = arith.constant 0 : index
    %52 = vector.load %arg2[%c0_48, %c0_49, %c0_50, %c0_51] : memref<1x4x2x128xf32, #tpu.memory_space<vmem>>, vector<1x1x2x128xf32>
    %53 = vector.shape_cast %52 : vector<1x1x2x128xf32> to vector<2x128xf32>
    %54 = vector.broadcast %51 : f32 to vector<2x128xf32>
    %55 = arith.mulf %54, %53 : vector<2x128xf32>
    %56 = arith.addf %50, %55 : vector<2x128xf32>
    %c1_52 = arith.constant 1 : index
    %c1_53 = arith.constant 1 : index
    %57 = memref.load %arg3[%c1_52, %c1_53] : memref<4x4xf32, #tpu.memory_space<smem>>
    %c0_54 = arith.constant 0 : index
    %c1_55 = arith.constant 1 : index
    %c0_56 = arith.constant 0 : index
    %c0_57 = arith.constant 0 : index
    %58 = vector.load %arg2[%c0_54, %c1_55, %c0_56, %c0_57] : memref<1x4x2x128xf32, #tpu.memory_space<vmem>>, vector<1x1x2x128xf32>
    %59 = vector.shape_cast %58 : vector<1x1x2x128xf32> to vector<2x128xf32>
    %60 = vector.broadcast %57 : f32 to vector<2x128xf32>
    %61 = arith.mulf %60, %59 : vector<2x128xf32>
    %62 = arith.addf %56, %61 : vector<2x128xf32>
    %c1_58 = arith.constant 1 : index
    %c2_59 = arith.constant 2 : index
    %63 = memref.load %arg3[%c1_58, %c2_59] : memref<4x4xf32, #tpu.memory_space<smem>>
    %c0_60 = arith.constant 0 : index
    %c2_61 = arith.constant 2 : index
    %c0_62 = arith.constant 0 : index
    %c0_63 = arith.constant 0 : index
    %64 = vector.load %arg2[%c0_60, %c2_61, %c0_62, %c0_63] : memref<1x4x2x128xf32, #tpu.memory_space<vmem>>, vector<1x1x2x128xf32>
    %65 = vector.shape_cast %64 : vector<1x1x2x128xf32> to vector<2x128xf32>
    %66 = vector.broadcast %63 : f32 to vector<2x128xf32>
    %67 = arith.mulf %66, %65 : vector<2x128xf32>
    %68 = arith.addf %62, %67 : vector<2x128xf32>
    %c1_64 = arith.constant 1 : index
    %c3_65 = arith.constant 3 : index
    %69 = memref.load %arg3[%c1_64, %c3_65] : memref<4x4xf32, #tpu.memory_space<smem>>
    %c0_66 = arith.constant 0 : index
    %c3_67 = arith.constant 3 : index
    %c0_68 = arith.constant 0 : index
    %c0_69 = arith.constant 0 : index
    %70 = vector.load %arg2[%c0_66, %c3_67, %c0_68, %c0_69] : memref<1x4x2x128xf32, #tpu.memory_space<vmem>>, vector<1x1x2x128xf32>
    %71 = vector.shape_cast %70 : vector<1x1x2x128xf32> to vector<2x128xf32>
    %72 = vector.broadcast %69 : f32 to vector<2x128xf32>
    %73 = arith.mulf %72, %71 : vector<2x128xf32>
    %74 = arith.addf %68, %73 : vector<2x128xf32>
    %c0_70 = arith.constant 0 : index
    %c1_71 = arith.constant 1 : index
    %c0_72 = arith.constant 0 : index
    %c0_73 = arith.constant 0 : index
    %75 = vector.load %arg5[%c0_70, %c1_71, %c0_72, %c0_73] : memref<1x4x2x128xf32, #tpu.memory_space<vmem>>, vector<1x1x2x128xf32>
    %76 = vector.shape_cast %75 : vector<1x1x2x128xf32> to vector<2x128xf32>
    %77 = vector.shape_cast %74 : vector<2x128xf32> to vector<1x1x2x128xf32>
    tpu.vector_store %arg5[%c0_70, %c1_71, %c0_72, %c0_73], %77 {strides = array<i32>} : memref<1x4x2x128xf32, #tpu.memory_space<vmem>>, vector<1x1x2x128xf32>,
    %c0_74 = arith.constant 0 : index
    %c1_75 = arith.constant 1 : index
    %c0_76 = arith.constant 0 : index
    %78 = vector.load %arg6[%c0_74, %c1_75, %c0_76] : memref<1x4x128xf32, #tpu.memory_space<vmem>>, vector<1x1x128xf32>
    %79 = vector.shape_cast %78 : vector<1x1x128xf32> to vector<1x128xf32>
    %cst_77 = arith.constant dense<0.000000e+00> : vector<128xf32>
    %80 = vector.multi_reduction <add>, %74, %cst_77 [0] : vector<2x128xf32> to vector<128xf32>
    %81 = vector.shape_cast %80 : vector<128xf32> to vector<1x128xf32>
    %82 = arith.addf %79, %81 : vector<1x128xf32>
    %c0_78 = arith.constant 0 : index
    %c1_79 = arith.constant 1 : index
    %c0_80 = arith.constant 0 : index
    %83 = vector.load %arg6[%c0_78, %c1_79, %c0_80] : memref<1x4x128xf32, #tpu.memory_space<vmem>>, vector<1x1x128xf32>
    %84 = vector.shape_cast %83 : vector<1x1x128xf32> to vector<1x128xf32>
    %85 = vector.shape_cast %82 : vector<1x128xf32> to vector<1x1x128xf32>
    tpu.vector_store %arg6[%c0_78, %c1_79, %c0_80], %85 {strides = array<i32>} : memref<1x4x128xf32, #tpu.memory_space<vmem>>, vector<1x1x128xf32>,
    %c0_81 = arith.constant 0 : index
    %c1_82 = arith.constant 1 : index
    %c0_83 = arith.constant 0 : index
    %86 = vector.load %arg7[%c0_81, %c1_82, %c0_83] : memref<1x4x128xf32, #tpu.memory_space<vmem>>, vector<1x1x128xf32>
    %87 = vector.shape_cast %86 : vector<1x1x128xf32> to vector<1x128xf32>
    %88 = arith.mulf %74, %74 : vector<2x128xf32>
    %cst_84 = arith.constant dense<0.000000e+00> : vector<128xf32>
    %89 = vector.multi_reduction <add>, %88, %cst_84 [0] : vector<2x128xf32> to vector<128xf32>
    %90 = vector.shape_cast %89 : vector<128xf32> to vector<1x128xf32>
    %91 = arith.addf %87, %90 : vector<1x128xf32>
    %c0_85 = arith.constant 0 : index
    %c1_86 = arith.constant 1 : index
    %c0_87 = arith.constant 0 : index
    %92 = vector.load %arg7[%c0_85, %c1_86, %c0_87] : memref<1x4x128xf32, #tpu.memory_space<vmem>>, vector<1x1x128xf32>
    %93 = vector.shape_cast %92 : vector<1x1x128xf32> to vector<1x128xf32>
    %94 = vector.shape_cast %91 : vector<1x128xf32> to vector<1x1x128xf32>
    tpu.vector_store %arg7[%c0_85, %c1_86, %c0_87], %94 {strides = array<i32>} : memref<1x4x128xf32, #tpu.memory_space<vmem>>, vector<1x1x128xf32>,
    %c0_88 = arith.constant 0 : index
    %c2_89 = arith.constant 2 : index
    %c0_90 = arith.constant 0 : index
    %c0_91 = arith.constant 0 : index
    %95 = vector.load %arg4[%c0_88, %c2_89, %c0_90, %c0_91] : memref<1x4x2x128xf32, #tpu.memory_space<vmem>>, vector<1x1x2x128xf32>
    %96 = vector.shape_cast %95 : vector<1x1x2x128xf32> to vector<2x128xf32>
    %c2_92 = arith.constant 2 : index
    %c0_93 = arith.constant 0 : index
    %97 = memref.load %arg3[%c2_92, %c0_93] : memref<4x4xf32, #tpu.memory_space<smem>>
    %c0_94 = arith.constant 0 : index
    %c0_95 = arith.constant 0 : index
    %c0_96 = arith.constant 0 : index
    %c0_97 = arith.constant 0 : index
    %98 = vector.load %arg2[%c0_94, %c0_95, %c0_96, %c0_97] : memref<1x4x2x128xf32, #tpu.memory_space<vmem>>, vector<1x1x2x128xf32>
    %99 = vector.shape_cast %98 : vector<1x1x2x128xf32> to vector<2x128xf32>
    %100 = vector.broadcast %97 : f32 to vector<2x128xf32>
    %101 = arith.mulf %100, %99 : vector<2x128xf32>
    %102 = arith.addf %96, %101 : vector<2x128xf32>
    %c2_98 = arith.constant 2 : index
    %c1_99 = arith.constant 1 : index
    %103 = memref.load %arg3[%c2_98, %c1_99] : memref<4x4xf32, #tpu.memory_space<smem>>
    %c0_100 = arith.constant 0 : index
    %c1_101 = arith.constant 1 : index
    %c0_102 = arith.constant 0 : index
    %c0_103 = arith.constant 0 : index
    %104 = vector.load %arg2[%c0_100, %c1_101, %c0_102, %c0_103] : memref<1x4x2x128xf32, #tpu.memory_space<vmem>>, vector<1x1x2x128xf32>
    %105 = vector.shape_cast %104 : vector<1x1x2x128xf32> to vector<2x128xf32>
    %106 = vector.broadcast %103 : f32 to vector<2x128xf32>
    %107 = arith.mulf %106, %105 : vector<2x128xf32>
    %108 = arith.addf %102, %107 : vector<2x128xf32>
    %c2_104 = arith.constant 2 : index
    %c2_105 = arith.constant 2 : index
    %109 = memref.load %arg3[%c2_104, %c2_105] : memref<4x4xf32, #tpu.memory_space<smem>>
    %c0_106 = arith.constant 0 : index
    %c2_107 = arith.constant 2 : index
    %c0_108 = arith.constant 0 : index
    %c0_109 = arith.constant 0 : index
    %110 = vector.load %arg2[%c0_106, %c2_107, %c0_108, %c0_109] : memref<1x4x2x128xf32, #tpu.memory_space<vmem>>, vector<1x1x2x128xf32>
    %111 = vector.shape_cast %110 : vector<1x1x2x128xf32> to vector<2x128xf32>
    %112 = vector.broadcast %109 : f32 to vector<2x128xf32>
    %113 = arith.mulf %112, %111 : vector<2x128xf32>
    %114 = arith.addf %108, %113 : vector<2x128xf32>
    %c2_110 = arith.constant 2 : index
    %c3_111 = arith.constant 3 : index
    %115 = memref.load %arg3[%c2_110, %c3_111] : memref<4x4xf32, #tpu.memory_space<smem>>
    %c0_112 = arith.constant 0 : index
    %c3_113 = arith.constant 3 : index
    %c0_114 = arith.constant 0 : index
    %c0_115 = arith.constant 0 : index
    %116 = vector.load %arg2[%c0_112, %c3_113, %c0_114, %c0_115] : memref<1x4x2x128xf32, #tpu.memory_space<vmem>>, vector<1x1x2x128xf32>
    %117 = vector.shape_cast %116 : vector<1x1x2x128xf32> to vector<2x128xf32>
    %118 = vector.broadcast %115 : f32 to vector<2x128xf32>
    %119 = arith.mulf %118, %117 : vector<2x128xf32>
    %120 = arith.addf %114, %119 : vector<2x128xf32>
    %c0_116 = arith.constant 0 : index
    %c2_117 = arith.constant 2 : index
    %c0_118 = arith.constant 0 : index
    %c0_119 = arith.constant 0 : index
    %121 = vector.load %arg5[%c0_116, %c2_117, %c0_118, %c0_119] : memref<1x4x2x128xf32, #tpu.memory_space<vmem>>, vector<1x1x2x128xf32>
    %122 = vector.shape_cast %121 : vector<1x1x2x128xf32> to vector<2x128xf32>
    %123 = vector.shape_cast %120 : vector<2x128xf32> to vector<1x1x2x128xf32>
    tpu.vector_store %arg5[%c0_116, %c2_117, %c0_118, %c0_119], %123 {strides = array<i32>} : memref<1x4x2x128xf32, #tpu.memory_space<vmem>>, vector<1x1x2x128xf32>,
    %c0_120 = arith.constant 0 : index
    %c2_121 = arith.constant 2 : index
    %c0_122 = arith.constant 0 : index
    %124 = vector.load %arg6[%c0_120, %c2_121, %c0_122] : memref<1x4x128xf32, #tpu.memory_space<vmem>>, vector<1x1x128xf32>
    %125 = vector.shape_cast %124 : vector<1x1x128xf32> to vector<1x128xf32>
    %cst_123 = arith.constant dense<0.000000e+00> : vector<128xf32>
    %126 = vector.multi_reduction <add>, %120, %cst_123 [0] : vector<2x128xf32> to vector<128xf32>
    %127 = vector.shape_cast %126 : vector<128xf32> to vector<1x128xf32>
    %128 = arith.addf %125, %127 : vector<1x128xf32>
    %c0_124 = arith.constant 0 : index
    %c2_125 = arith.constant 2 : index
    %c0_126 = arith.constant 0 : index
    %129 = vector.load %arg6[%c0_124, %c2_125, %c0_126] : memref<1x4x128xf32, #tpu.memory_space<vmem>>, vector<1x1x128xf32>
    %130 = vector.shape_cast %129 : vector<1x1x128xf32> to vector<1x128xf32>
    %131 = vector.shape_cast %128 : vector<1x128xf32> to vector<1x1x128xf32>
    tpu.vector_store %arg6[%c0_124, %c2_125, %c0_126], %131 {strides = array<i32>} : memref<1x4x128xf32, #tpu.memory_space<vmem>>, vector<1x1x128xf32>,
    %c0_127 = arith.constant 0 : index
    %c2_128 = arith.constant 2 : index
    %c0_129 = arith.constant 0 : index
    %132 = vector.load %arg7[%c0_127, %c2_128, %c0_129] : memref<1x4x128xf32, #tpu.memory_space<vmem>>, vector<1x1x128xf32>
    %133 = vector.shape_cast %132 : vector<1x1x128xf32> to vector<1x128xf32>
    %134 = arith.mulf %120, %120 : vector<2x128xf32>
    %cst_130 = arith.constant dense<0.000000e+00> : vector<128xf32>
    %135 = vector.multi_reduction <add>, %134, %cst_130 [0] : vector<2x128xf32> to vector<128xf32>
    %136 = vector.shape_cast %135 : vector<128xf32> to vector<1x128xf32>
    %137 = arith.addf %133, %136 : vector<1x128xf32>
    %c0_131 = arith.constant 0 : index
    %c2_132 = arith.constant 2 : index
    %c0_133 = arith.constant 0 : index
    %138 = vector.load %arg7[%c0_131, %c2_132, %c0_133] : memref<1x4x128xf32, #tpu.memory_space<vmem>>, vector<1x1x128xf32>
    %139 = vector.shape_cast %138 : vector<1x1x128xf32> to vector<1x128xf32>
    %140 = vector.shape_cast %137 : vector<1x128xf32> to vector<1x1x128xf32>
    tpu.vector_store %arg7[%c0_131, %c2_132, %c0_133], %140 {strides = array<i32>} : memref<1x4x128xf32, #tpu.memory_space<vmem>>, vector<1x1x128xf32>,
    %c0_134 = arith.constant 0 : index
    %c3_135 = arith.constant 3 : index
    %c0_136 = arith.constant 0 : index
    %c0_137 = arith.constant 0 : index
    %141 = vector.load %arg4[%c0_134, %c3_135, %c0_136, %c0_137] : memref<1x4x2x128xf32, #tpu.memory_space<vmem>>, vector<1x1x2x128xf32>
    %142 = vector.shape_cast %141 : vector<1x1x2x128xf32> to vector<2x128xf32>
    %c3_138 = arith.constant 3 : index
    %c0_139 = arith.constant 0 : index
    %143 = memref.load %arg3[%c3_138, %c0_139] : memref<4x4xf32, #tpu.memory_space<smem>>
    %c0_140 = arith.constant 0 : index
    %c0_141 = arith.constant 0 : index
    %c0_142 = arith.constant 0 : index
    %c0_143 = arith.constant 0 : index
    %144 = vector.load %arg2[%c0_140, %c0_141, %c0_142, %c0_143] : memref<1x4x2x128xf32, #tpu.memory_space<vmem>>, vector<1x1x2x128xf32>
    %145 = vector.shape_cast %144 : vector<1x1x2x128xf32> to vector<2x128xf32>
    %146 = vector.broadcast %143 : f32 to vector<2x128xf32>
    %147 = arith.mulf %146, %145 : vector<2x128xf32>
    %148 = arith.addf %142, %147 : vector<2x128xf32>
    %c3_144 = arith.constant 3 : index
    %c1_145 = arith.constant 1 : index
    %149 = memref.load %arg3[%c3_144, %c1_145] : memref<4x4xf32, #tpu.memory_space<smem>>
    %c0_146 = arith.constant 0 : index
    %c1_147 = arith.constant 1 : index
    %c0_148 = arith.constant 0 : index
    %c0_149 = arith.constant 0 : index
    %150 = vector.load %arg2[%c0_146, %c1_147, %c0_148, %c0_149] : memref<1x4x2x128xf32, #tpu.memory_space<vmem>>, vector<1x1x2x128xf32>
    %151 = vector.shape_cast %150 : vector<1x1x2x128xf32> to vector<2x128xf32>
    %152 = vector.broadcast %149 : f32 to vector<2x128xf32>
    %153 = arith.mulf %152, %151 : vector<2x128xf32>
    %154 = arith.addf %148, %153 : vector<2x128xf32>
    %c3_150 = arith.constant 3 : index
    %c2_151 = arith.constant 2 : index
    %155 = memref.load %arg3[%c3_150, %c2_151] : memref<4x4xf32, #tpu.memory_space<smem>>
    %c0_152 = arith.constant 0 : index
    %c2_153 = arith.constant 2 : index
    %c0_154 = arith.constant 0 : index
    %c0_155 = arith.constant 0 : index
    %156 = vector.load %arg2[%c0_152, %c2_153, %c0_154, %c0_155] : memref<1x4x2x128xf32, #tpu.memory_space<vmem>>, vector<1x1x2x128xf32>
    %157 = vector.shape_cast %156 : vector<1x1x2x128xf32> to vector<2x128xf32>
    %158 = vector.broadcast %155 : f32 to vector<2x128xf32>
    %159 = arith.mulf %158, %157 : vector<2x128xf32>
    %160 = arith.addf %154, %159 : vector<2x128xf32>
    %c3_156 = arith.constant 3 : index
    %c3_157 = arith.constant 3 : index
    %161 = memref.load %arg3[%c3_156, %c3_157] : memref<4x4xf32, #tpu.memory_space<smem>>
    %c0_158 = arith.constant 0 : index
    %c3_159 = arith.constant 3 : index
    %c0_160 = arith.constant 0 : index
    %c0_161 = arith.constant 0 : index
    %162 = vector.load %arg2[%c0_158, %c3_159, %c0_160, %c0_161] : memref<1x4x2x128xf32, #tpu.memory_space<vmem>>, vector<1x1x2x128xf32>
    %163 = vector.shape_cast %162 : vector<1x1x2x128xf32> to vector<2x128xf32>
    %164 = vector.broadcast %161 : f32 to vector<2x128xf32>
    %165 = arith.mulf %164, %163 : vector<2x128xf32>
    %166 = arith.addf %160, %165 : vector<2x128xf32>
    %c0_162 = arith.constant 0 : index
    %c3_163 = arith.constant 3 : index
    %c0_164 = arith.constant 0 : index
    %c0_165 = arith.constant 0 : index
    %167 = vector.load %arg5[%c0_162, %c3_163, %c0_164, %c0_165] : memref<1x4x2x128xf32, #tpu.memory_space<vmem>>, vector<1x1x2x128xf32>
    %168 = vector.shape_cast %167 : vector<1x1x2x128xf32> to vector<2x128xf32>
    %169 = vector.shape_cast %166 : vector<2x128xf32> to vector<1x1x2x128xf32>
    tpu.vector_store %arg5[%c0_162, %c3_163, %c0_164, %c0_165], %169 {strides = array<i32>} : memref<1x4x2x128xf32, #tpu.memory_space<vmem>>, vector<1x1x2x128xf32>,
    %c0_166 = arith.constant 0 : index
    %c3_167 = arith.constant 3 : index
    %c0_168 = arith.constant 0 : index
    %170 = vector.load %arg6[%c0_166, %c3_167, %c0_168] : memref<1x4x128xf32, #tpu.memory_space<vmem>>, vector<1x1x128xf32>
    %171 = vector.shape_cast %170 : vector<1x1x128xf32> to vector<1x128xf32>
    %cst_169 = arith.constant dense<0.000000e+00> : vector<128xf32>
    %172 = vector.multi_reduction <add>, %166, %cst_169 [0] : vector<2x128xf32> to vector<128xf32>
    %173 = vector.shape_cast %172 : vector<128xf32> to vector<1x128xf32>
    %174 = arith.addf %171, %173 : vector<1x128xf32>
    %c0_170 = arith.constant 0 : index
    %c3_171 = arith.constant 3 : index
    %c0_172 = arith.constant 0 : index
    %175 = vector.load %arg6[%c0_170, %c3_171, %c0_172] : memref<1x4x128xf32, #tpu.memory_space<vmem>>, vector<1x1x128xf32>
    %176 = vector.shape_cast %175 : vector<1x1x128xf32> to vector<1x128xf32>
    %177 = vector.shape_cast %174 : vector<1x128xf32> to vector<1x1x128xf32>
    tpu.vector_store %arg6[%c0_170, %c3_171, %c0_172], %177 {strides = array<i32>} : memref<1x4x128xf32, #tpu.memory_space<vmem>>, vector<1x1x128xf32>,
    %c0_173 = arith.constant 0 : index
    %c3_174 = arith.constant 3 : index
    %c0_175 = arith.constant 0 : index
    %178 = vector.load %arg7[%c0_173, %c3_174, %c0_175] : memref<1x4x128xf32, #tpu.memory_space<vmem>>, vector<1x1x128xf32>
    %179 = vector.shape_cast %178 : vector<1x1x128xf32> to vector<1x128xf32>
    %180 = arith.mulf %166, %166 : vector<2x128xf32>
    %cst_176 = arith.constant dense<0.000000e+00> : vector<128xf32>
    %181 = vector.multi_reduction <add>, %180, %cst_176 [0] : vector<2x128xf32> to vector<128xf32>
    %182 = vector.shape_cast %181 : vector<128xf32> to vector<1x128xf32>
    %183 = arith.addf %179, %182 : vector<1x128xf32>
    %c0_177 = arith.constant 0 : index
    %c3_178 = arith.constant 3 : index
    %c0_179 = arith.constant 0 : index
    %184 = vector.load %arg7[%c0_177, %c3_178, %c0_179] : memref<1x4x128xf32, #tpu.memory_space<vmem>>, vector<1x1x128xf32>
    %185 = vector.shape_cast %184 : vector<1x1x128xf32> to vector<1x128xf32>
    %186 = vector.shape_cast %183 : vector<1x128xf32> to vector<1x1x128xf32>
    tpu.vector_store %arg7[%c0_177, %c3_178, %c0_179], %186 {strides = array<i32>} : memref<1x4x128xf32, #tpu.memory_space<vmem>>, vector<1x1x128xf32>,
    return
  }
  func.func @transform_0(%arg0: i32, %arg1: i32) -> (i32, i32, i32, i32) {
    %c0_i32 = arith.constant 0 : i32
    %c0_i32_0 = arith.constant 0 : i32
    %c0_i32_1 = arith.constant 0 : i32
    return %arg0, %c0_i32, %arg1, %c0_i32_0 : i32, i32, i32, i32
  }
  func.func @transform_1(%arg0: i32, %arg1: i32) -> (i32, i32) {
    %c0_i32 = arith.constant 0 : i32
    %c0_i32_0 = arith.constant 0 : i32
    %c0_i32_1 = arith.constant 0 : i32
    return %c0_i32, %c0_i32_0 : i32, i32
  }
  func.func @transform_2(%arg0: i32, %arg1: i32) -> (i32, i32, i32, i32) {
    %c0_i32 = arith.constant 0 : i32
    %c0_i32_0 = arith.constant 0 : i32
    %c0_i32_1 = arith.constant 0 : i32
    return %arg0, %c0_i32, %arg1, %c0_i32_0 : i32, i32, i32, i32
  }
  func.func @transform_3(%arg0: i32, %arg1: i32) -> (i32, i32, i32, i32) {
    %c0_i32 = arith.constant 0 : i32
    %c0_i32_0 = arith.constant 0 : i32
    %c0_i32_1 = arith.constant 0 : i32
    return %arg0, %c0_i32, %arg1, %c0_i32_0 : i32, i32, i32, i32
  }
  func.func @transform_4(%arg0: i32, %arg1: i32) -> (i32, i32, i32) {
    %c0_i32 = arith.constant 0 : i32
    %c0_i32_0 = arith.constant 0 : i32
    %c0_i32_1 = arith.constant 0 : i32
    return %arg0, %c0_i32, %c0_i32_0 : i32, i32, i32
  }
  func.func @transform_5(%arg0: i32, %arg1: i32) -> (i32, i32, i32) {
    %c0_i32 = arith.constant 0 : i32
    %c0_i32_0 = arith.constant 0 : i32
    %c0_i32_1 = arith.constant 0 : i32
    return %arg0, %c0_i32, %c0_i32_0 : i32, i32, i32
  }
}

module attributes {stable_mosaic.version = 11 : i64} {
  func.func @kernel(%arg0: i32, %arg1: i32, %arg2: memref<1x4x2x128xf32, #tpu.memory_space<vmem>>, %arg3: memref<4xf32, #tpu.memory_space<smem>>, %arg4: memref<4xf32, #tpu.memory_space<smem>>, %arg5: memref<1x4x2x128xf32, #tpu.memory_space<vmem>>) attributes {dimension_semantics = [#tpu.dimension_semantics<parallel>, #tpu.dimension_semantics<parallel>], iteration_bounds = array<i64: 2, 1>, scalar_prefetch = 0 : i64, scratch_operands = 0 : i64, tpu.core_type = #tpu.core_type<tc>, window_params = [{transform_indices = @transform_0, window_bounds = array<i64: 1, 4, 2, 128>}, {transform_indices = @transform_1, window_bounds = array<i64: 4>}, {transform_indices = @transform_2, window_bounds = array<i64: 4>}, {transform_indices = @transform_3, window_bounds = array<i64: 1, 4, 2, 128>}]} {
    %c0 = arith.constant 0 : index
    %c0_0 = arith.constant 0 : index
    %c0_1 = arith.constant 0 : index
    %c0_2 = arith.constant 0 : index
    %0 = vector.load %arg2[%c0, %c0_0, %c0_1, %c0_2] : memref<1x4x2x128xf32, #tpu.memory_space<vmem>>, vector<1x1x2x128xf32>
    %1 = vector.shape_cast %0 : vector<1x1x2x128xf32> to vector<2x128xf32>
    %c0_3 = arith.constant 0 : index
    %2 = memref.load %arg3[%c0_3] : memref<4xf32, #tpu.memory_space<smem>>
    %3 = vector.broadcast %2 : f32 to vector<2x128xf32>
    %4 = arith.mulf %1, %3 : vector<2x128xf32>
    %c0_4 = arith.constant 0 : index
    %5 = memref.load %arg4[%c0_4] : memref<4xf32, #tpu.memory_space<smem>>
    %6 = vector.broadcast %5 : f32 to vector<2x128xf32>
    %7 = arith.addf %4, %6 : vector<2x128xf32>
    %cst = arith.constant 5.000000e-01 : f32
    %8 = vector.broadcast %cst : f32 to vector<2x128xf32>
    %9 = arith.mulf %8, %7 : vector<2x128xf32>
    %cst_5 = arith.constant 0.707106769 : f32
    %10 = vector.broadcast %cst_5 : f32 to vector<2x128xf32>
    %11 = arith.mulf %7, %10 : vector<2x128xf32>
    %12 = math.absf %11 : vector<2x128xf32>
    %cst_6 = arith.constant 0.327591091 : f32
    %13 = vector.broadcast %cst_6 : f32 to vector<2x128xf32>
    %14 = arith.mulf %13, %12 : vector<2x128xf32>
    %cst_7 = arith.constant 1.000000e+00 : f32
    %15 = vector.broadcast %cst_7 : f32 to vector<2x128xf32>
    %16 = arith.addf %15, %14 : vector<2x128xf32>
    %17 = tpu.reciprocal %16 {approx = true} : vector<2x128xf32> -> vector<2x128xf32>
    %18 = arith.mulf %16, %17 : vector<2x128xf32>
    %cst_8 = arith.constant 2.000000e+00 : f32
    %19 = vector.broadcast %cst_8 : f32 to vector<2x128xf32>
    %20 = arith.subf %19, %18 : vector<2x128xf32>
    %21 = arith.mulf %17, %20 : vector<2x128xf32>
    %cst_9 = arith.constant 1.06140542 : f32
    %22 = vector.broadcast %cst_9 : f32 to vector<2x128xf32>
    %23 = arith.mulf %21, %22 : vector<2x128xf32>
    %cst_10 = arith.constant -1.45315206 : f32
    %24 = vector.broadcast %cst_10 : f32 to vector<2x128xf32>
    %25 = arith.addf %24, %23 : vector<2x128xf32>
    %26 = arith.mulf %21, %25 : vector<2x128xf32>
    %cst_11 = arith.constant 1.42141378 : f32
    %27 = vector.broadcast %cst_11 : f32 to vector<2x128xf32>
    %28 = arith.addf %27, %26 : vector<2x128xf32>
    %29 = arith.mulf %21, %28 : vector<2x128xf32>
    %cst_12 = arith.constant -0.284496725 : f32
    %30 = vector.broadcast %cst_12 : f32 to vector<2x128xf32>
    %31 = arith.addf %30, %29 : vector<2x128xf32>
    %32 = arith.mulf %21, %31 : vector<2x128xf32>
    %cst_13 = arith.constant 0.254829586 : f32
    %33 = vector.broadcast %cst_13 : f32 to vector<2x128xf32>
    %34 = arith.addf %33, %32 : vector<2x128xf32>
    %35 = arith.mulf %21, %34 : vector<2x128xf32>
    %36 = arith.mulf %11, %11 : vector<2x128xf32>
    %cst_14 = arith.constant 0.000000e+00 : f32
    %37 = vector.broadcast %cst_14 : f32 to vector<2x128xf32>
    %38 = arith.subf %37, %36 : vector<2x128xf32>
    %39 = math.exp %38 : vector<2x128xf32>
    %40 = arith.mulf %35, %39 : vector<2x128xf32>
    %cst_15 = arith.constant 1.000000e+00 : f32
    %41 = vector.broadcast %cst_15 : f32 to vector<2x128xf32>
    %42 = arith.subf %41, %40 : vector<2x128xf32>
    %cst_16 = arith.constant 0.000000e+00 : f32
    %43 = vector.broadcast %cst_16 : f32 to vector<2x128xf32>
    %44 = arith.cmpf oge, %11, %43 : vector<2x128xf32>
    %cst_17 = arith.constant 0.000000e+00 : f32
    %45 = vector.broadcast %cst_17 : f32 to vector<2x128xf32>
    %46 = arith.subf %45, %42 : vector<2x128xf32>
    %47 = arith.select %44, %42, %46 : vector<2x128xi1>, vector<2x128xf32>
    %cst_18 = arith.constant 1.000000e+00 : f32
    %48 = vector.broadcast %cst_18 : f32 to vector<2x128xf32>
    %49 = arith.addf %48, %47 : vector<2x128xf32>
    %50 = arith.mulf %9, %49 : vector<2x128xf32>
    %c0_19 = arith.constant 0 : index
    %c0_20 = arith.constant 0 : index
    %c0_21 = arith.constant 0 : index
    %c0_22 = arith.constant 0 : index
    %51 = vector.load %arg5[%c0_19, %c0_20, %c0_21, %c0_22] : memref<1x4x2x128xf32, #tpu.memory_space<vmem>>, vector<1x1x2x128xf32>
    %52 = vector.shape_cast %51 : vector<1x1x2x128xf32> to vector<2x128xf32>
    %53 = vector.shape_cast %50 : vector<2x128xf32> to vector<1x1x2x128xf32>
    tpu.vector_store %arg5[%c0_19, %c0_20, %c0_21, %c0_22], %53 {strides = array<i32>} : memref<1x4x2x128xf32, #tpu.memory_space<vmem>>, vector<1x1x2x128xf32>,
    %c0_23 = arith.constant 0 : index
    %c1 = arith.constant 1 : index
    %c0_24 = arith.constant 0 : index
    %c0_25 = arith.constant 0 : index
    %54 = vector.load %arg2[%c0_23, %c1, %c0_24, %c0_25] : memref<1x4x2x128xf32, #tpu.memory_space<vmem>>, vector<1x1x2x128xf32>
    %55 = vector.shape_cast %54 : vector<1x1x2x128xf32> to vector<2x128xf32>
    %c1_26 = arith.constant 1 : index
    %56 = memref.load %arg3[%c1_26] : memref<4xf32, #tpu.memory_space<smem>>
    %57 = vector.broadcast %56 : f32 to vector<2x128xf32>
    %58 = arith.mulf %55, %57 : vector<2x128xf32>
    %c1_27 = arith.constant 1 : index
    %59 = memref.load %arg4[%c1_27] : memref<4xf32, #tpu.memory_space<smem>>
    %60 = vector.broadcast %59 : f32 to vector<2x128xf32>
    %61 = arith.addf %58, %60 : vector<2x128xf32>
    %cst_28 = arith.constant 5.000000e-01 : f32
    %62 = vector.broadcast %cst_28 : f32 to vector<2x128xf32>
    %63 = arith.mulf %62, %61 : vector<2x128xf32>
    %cst_29 = arith.constant 0.707106769 : f32
    %64 = vector.broadcast %cst_29 : f32 to vector<2x128xf32>
    %65 = arith.mulf %61, %64 : vector<2x128xf32>
    %66 = math.absf %65 : vector<2x128xf32>
    %cst_30 = arith.constant 0.327591091 : f32
    %67 = vector.broadcast %cst_30 : f32 to vector<2x128xf32>
    %68 = arith.mulf %67, %66 : vector<2x128xf32>
    %cst_31 = arith.constant 1.000000e+00 : f32
    %69 = vector.broadcast %cst_31 : f32 to vector<2x128xf32>
    %70 = arith.addf %69, %68 : vector<2x128xf32>
    %71 = tpu.reciprocal %70 {approx = true} : vector<2x128xf32> -> vector<2x128xf32>
    %72 = arith.mulf %70, %71 : vector<2x128xf32>
    %cst_32 = arith.constant 2.000000e+00 : f32
    %73 = vector.broadcast %cst_32 : f32 to vector<2x128xf32>
    %74 = arith.subf %73, %72 : vector<2x128xf32>
    %75 = arith.mulf %71, %74 : vector<2x128xf32>
    %cst_33 = arith.constant 1.06140542 : f32
    %76 = vector.broadcast %cst_33 : f32 to vector<2x128xf32>
    %77 = arith.mulf %75, %76 : vector<2x128xf32>
    %cst_34 = arith.constant -1.45315206 : f32
    %78 = vector.broadcast %cst_34 : f32 to vector<2x128xf32>
    %79 = arith.addf %78, %77 : vector<2x128xf32>
    %80 = arith.mulf %75, %79 : vector<2x128xf32>
    %cst_35 = arith.constant 1.42141378 : f32
    %81 = vector.broadcast %cst_35 : f32 to vector<2x128xf32>
    %82 = arith.addf %81, %80 : vector<2x128xf32>
    %83 = arith.mulf %75, %82 : vector<2x128xf32>
    %cst_36 = arith.constant -0.284496725 : f32
    %84 = vector.broadcast %cst_36 : f32 to vector<2x128xf32>
    %85 = arith.addf %84, %83 : vector<2x128xf32>
    %86 = arith.mulf %75, %85 : vector<2x128xf32>
    %cst_37 = arith.constant 0.254829586 : f32
    %87 = vector.broadcast %cst_37 : f32 to vector<2x128xf32>
    %88 = arith.addf %87, %86 : vector<2x128xf32>
    %89 = arith.mulf %75, %88 : vector<2x128xf32>
    %90 = arith.mulf %65, %65 : vector<2x128xf32>
    %cst_38 = arith.constant 0.000000e+00 : f32
    %91 = vector.broadcast %cst_38 : f32 to vector<2x128xf32>
    %92 = arith.subf %91, %90 : vector<2x128xf32>
    %93 = math.exp %92 : vector<2x128xf32>
    %94 = arith.mulf %89, %93 : vector<2x128xf32>
    %cst_39 = arith.constant 1.000000e+00 : f32
    %95 = vector.broadcast %cst_39 : f32 to vector<2x128xf32>
    %96 = arith.subf %95, %94 : vector<2x128xf32>
    %cst_40 = arith.constant 0.000000e+00 : f32
    %97 = vector.broadcast %cst_40 : f32 to vector<2x128xf32>
    %98 = arith.cmpf oge, %65, %97 : vector<2x128xf32>
    %cst_41 = arith.constant 0.000000e+00 : f32
    %99 = vector.broadcast %cst_41 : f32 to vector<2x128xf32>
    %100 = arith.subf %99, %96 : vector<2x128xf32>
    %101 = arith.select %98, %96, %100 : vector<2x128xi1>, vector<2x128xf32>
    %cst_42 = arith.constant 1.000000e+00 : f32
    %102 = vector.broadcast %cst_42 : f32 to vector<2x128xf32>
    %103 = arith.addf %102, %101 : vector<2x128xf32>
    %104 = arith.mulf %63, %103 : vector<2x128xf32>
    %c0_43 = arith.constant 0 : index
    %c1_44 = arith.constant 1 : index
    %c0_45 = arith.constant 0 : index
    %c0_46 = arith.constant 0 : index
    %105 = vector.load %arg5[%c0_43, %c1_44, %c0_45, %c0_46] : memref<1x4x2x128xf32, #tpu.memory_space<vmem>>, vector<1x1x2x128xf32>
    %106 = vector.shape_cast %105 : vector<1x1x2x128xf32> to vector<2x128xf32>
    %107 = vector.shape_cast %104 : vector<2x128xf32> to vector<1x1x2x128xf32>
    tpu.vector_store %arg5[%c0_43, %c1_44, %c0_45, %c0_46], %107 {strides = array<i32>} : memref<1x4x2x128xf32, #tpu.memory_space<vmem>>, vector<1x1x2x128xf32>,
    %c0_47 = arith.constant 0 : index
    %c2 = arith.constant 2 : index
    %c0_48 = arith.constant 0 : index
    %c0_49 = arith.constant 0 : index
    %108 = vector.load %arg2[%c0_47, %c2, %c0_48, %c0_49] : memref<1x4x2x128xf32, #tpu.memory_space<vmem>>, vector<1x1x2x128xf32>
    %109 = vector.shape_cast %108 : vector<1x1x2x128xf32> to vector<2x128xf32>
    %c2_50 = arith.constant 2 : index
    %110 = memref.load %arg3[%c2_50] : memref<4xf32, #tpu.memory_space<smem>>
    %111 = vector.broadcast %110 : f32 to vector<2x128xf32>
    %112 = arith.mulf %109, %111 : vector<2x128xf32>
    %c2_51 = arith.constant 2 : index
    %113 = memref.load %arg4[%c2_51] : memref<4xf32, #tpu.memory_space<smem>>
    %114 = vector.broadcast %113 : f32 to vector<2x128xf32>
    %115 = arith.addf %112, %114 : vector<2x128xf32>
    %cst_52 = arith.constant 5.000000e-01 : f32
    %116 = vector.broadcast %cst_52 : f32 to vector<2x128xf32>
    %117 = arith.mulf %116, %115 : vector<2x128xf32>
    %cst_53 = arith.constant 0.707106769 : f32
    %118 = vector.broadcast %cst_53 : f32 to vector<2x128xf32>
    %119 = arith.mulf %115, %118 : vector<2x128xf32>
    %120 = math.absf %119 : vector<2x128xf32>
    %cst_54 = arith.constant 0.327591091 : f32
    %121 = vector.broadcast %cst_54 : f32 to vector<2x128xf32>
    %122 = arith.mulf %121, %120 : vector<2x128xf32>
    %cst_55 = arith.constant 1.000000e+00 : f32
    %123 = vector.broadcast %cst_55 : f32 to vector<2x128xf32>
    %124 = arith.addf %123, %122 : vector<2x128xf32>
    %125 = tpu.reciprocal %124 {approx = true} : vector<2x128xf32> -> vector<2x128xf32>
    %126 = arith.mulf %124, %125 : vector<2x128xf32>
    %cst_56 = arith.constant 2.000000e+00 : f32
    %127 = vector.broadcast %cst_56 : f32 to vector<2x128xf32>
    %128 = arith.subf %127, %126 : vector<2x128xf32>
    %129 = arith.mulf %125, %128 : vector<2x128xf32>
    %cst_57 = arith.constant 1.06140542 : f32
    %130 = vector.broadcast %cst_57 : f32 to vector<2x128xf32>
    %131 = arith.mulf %129, %130 : vector<2x128xf32>
    %cst_58 = arith.constant -1.45315206 : f32
    %132 = vector.broadcast %cst_58 : f32 to vector<2x128xf32>
    %133 = arith.addf %132, %131 : vector<2x128xf32>
    %134 = arith.mulf %129, %133 : vector<2x128xf32>
    %cst_59 = arith.constant 1.42141378 : f32
    %135 = vector.broadcast %cst_59 : f32 to vector<2x128xf32>
    %136 = arith.addf %135, %134 : vector<2x128xf32>
    %137 = arith.mulf %129, %136 : vector<2x128xf32>
    %cst_60 = arith.constant -0.284496725 : f32
    %138 = vector.broadcast %cst_60 : f32 to vector<2x128xf32>
    %139 = arith.addf %138, %137 : vector<2x128xf32>
    %140 = arith.mulf %129, %139 : vector<2x128xf32>
    %cst_61 = arith.constant 0.254829586 : f32
    %141 = vector.broadcast %cst_61 : f32 to vector<2x128xf32>
    %142 = arith.addf %141, %140 : vector<2x128xf32>
    %143 = arith.mulf %129, %142 : vector<2x128xf32>
    %144 = arith.mulf %119, %119 : vector<2x128xf32>
    %cst_62 = arith.constant 0.000000e+00 : f32
    %145 = vector.broadcast %cst_62 : f32 to vector<2x128xf32>
    %146 = arith.subf %145, %144 : vector<2x128xf32>
    %147 = math.exp %146 : vector<2x128xf32>
    %148 = arith.mulf %143, %147 : vector<2x128xf32>
    %cst_63 = arith.constant 1.000000e+00 : f32
    %149 = vector.broadcast %cst_63 : f32 to vector<2x128xf32>
    %150 = arith.subf %149, %148 : vector<2x128xf32>
    %cst_64 = arith.constant 0.000000e+00 : f32
    %151 = vector.broadcast %cst_64 : f32 to vector<2x128xf32>
    %152 = arith.cmpf oge, %119, %151 : vector<2x128xf32>
    %cst_65 = arith.constant 0.000000e+00 : f32
    %153 = vector.broadcast %cst_65 : f32 to vector<2x128xf32>
    %154 = arith.subf %153, %150 : vector<2x128xf32>
    %155 = arith.select %152, %150, %154 : vector<2x128xi1>, vector<2x128xf32>
    %cst_66 = arith.constant 1.000000e+00 : f32
    %156 = vector.broadcast %cst_66 : f32 to vector<2x128xf32>
    %157 = arith.addf %156, %155 : vector<2x128xf32>
    %158 = arith.mulf %117, %157 : vector<2x128xf32>
    %c0_67 = arith.constant 0 : index
    %c2_68 = arith.constant 2 : index
    %c0_69 = arith.constant 0 : index
    %c0_70 = arith.constant 0 : index
    %159 = vector.load %arg5[%c0_67, %c2_68, %c0_69, %c0_70] : memref<1x4x2x128xf32, #tpu.memory_space<vmem>>, vector<1x1x2x128xf32>
    %160 = vector.shape_cast %159 : vector<1x1x2x128xf32> to vector<2x128xf32>
    %161 = vector.shape_cast %158 : vector<2x128xf32> to vector<1x1x2x128xf32>
    tpu.vector_store %arg5[%c0_67, %c2_68, %c0_69, %c0_70], %161 {strides = array<i32>} : memref<1x4x2x128xf32, #tpu.memory_space<vmem>>, vector<1x1x2x128xf32>,
    %c0_71 = arith.constant 0 : index
    %c3 = arith.constant 3 : index
    %c0_72 = arith.constant 0 : index
    %c0_73 = arith.constant 0 : index
    %162 = vector.load %arg2[%c0_71, %c3, %c0_72, %c0_73] : memref<1x4x2x128xf32, #tpu.memory_space<vmem>>, vector<1x1x2x128xf32>
    %163 = vector.shape_cast %162 : vector<1x1x2x128xf32> to vector<2x128xf32>
    %c3_74 = arith.constant 3 : index
    %164 = memref.load %arg3[%c3_74] : memref<4xf32, #tpu.memory_space<smem>>
    %165 = vector.broadcast %164 : f32 to vector<2x128xf32>
    %166 = arith.mulf %163, %165 : vector<2x128xf32>
    %c3_75 = arith.constant 3 : index
    %167 = memref.load %arg4[%c3_75] : memref<4xf32, #tpu.memory_space<smem>>
    %168 = vector.broadcast %167 : f32 to vector<2x128xf32>
    %169 = arith.addf %166, %168 : vector<2x128xf32>
    %cst_76 = arith.constant 5.000000e-01 : f32
    %170 = vector.broadcast %cst_76 : f32 to vector<2x128xf32>
    %171 = arith.mulf %170, %169 : vector<2x128xf32>
    %cst_77 = arith.constant 0.707106769 : f32
    %172 = vector.broadcast %cst_77 : f32 to vector<2x128xf32>
    %173 = arith.mulf %169, %172 : vector<2x128xf32>
    %174 = math.absf %173 : vector<2x128xf32>
    %cst_78 = arith.constant 0.327591091 : f32
    %175 = vector.broadcast %cst_78 : f32 to vector<2x128xf32>
    %176 = arith.mulf %175, %174 : vector<2x128xf32>
    %cst_79 = arith.constant 1.000000e+00 : f32
    %177 = vector.broadcast %cst_79 : f32 to vector<2x128xf32>
    %178 = arith.addf %177, %176 : vector<2x128xf32>
    %179 = tpu.reciprocal %178 {approx = true} : vector<2x128xf32> -> vector<2x128xf32>
    %180 = arith.mulf %178, %179 : vector<2x128xf32>
    %cst_80 = arith.constant 2.000000e+00 : f32
    %181 = vector.broadcast %cst_80 : f32 to vector<2x128xf32>
    %182 = arith.subf %181, %180 : vector<2x128xf32>
    %183 = arith.mulf %179, %182 : vector<2x128xf32>
    %cst_81 = arith.constant 1.06140542 : f32
    %184 = vector.broadcast %cst_81 : f32 to vector<2x128xf32>
    %185 = arith.mulf %183, %184 : vector<2x128xf32>
    %cst_82 = arith.constant -1.45315206 : f32
    %186 = vector.broadcast %cst_82 : f32 to vector<2x128xf32>
    %187 = arith.addf %186, %185 : vector<2x128xf32>
    %188 = arith.mulf %183, %187 : vector<2x128xf32>
    %cst_83 = arith.constant 1.42141378 : f32
    %189 = vector.broadcast %cst_83 : f32 to vector<2x128xf32>
    %190 = arith.addf %189, %188 : vector<2x128xf32>
    %191 = arith.mulf %183, %190 : vector<2x128xf32>
    %cst_84 = arith.constant -0.284496725 : f32
    %192 = vector.broadcast %cst_84 : f32 to vector<2x128xf32>
    %193 = arith.addf %192, %191 : vector<2x128xf32>
    %194 = arith.mulf %183, %193 : vector<2x128xf32>
    %cst_85 = arith.constant 0.254829586 : f32
    %195 = vector.broadcast %cst_85 : f32 to vector<2x128xf32>
    %196 = arith.addf %195, %194 : vector<2x128xf32>
    %197 = arith.mulf %183, %196 : vector<2x128xf32>
    %198 = arith.mulf %173, %173 : vector<2x128xf32>
    %cst_86 = arith.constant 0.000000e+00 : f32
    %199 = vector.broadcast %cst_86 : f32 to vector<2x128xf32>
    %200 = arith.subf %199, %198 : vector<2x128xf32>
    %201 = math.exp %200 : vector<2x128xf32>
    %202 = arith.mulf %197, %201 : vector<2x128xf32>
    %cst_87 = arith.constant 1.000000e+00 : f32
    %203 = vector.broadcast %cst_87 : f32 to vector<2x128xf32>
    %204 = arith.subf %203, %202 : vector<2x128xf32>
    %cst_88 = arith.constant 0.000000e+00 : f32
    %205 = vector.broadcast %cst_88 : f32 to vector<2x128xf32>
    %206 = arith.cmpf oge, %173, %205 : vector<2x128xf32>
    %cst_89 = arith.constant 0.000000e+00 : f32
    %207 = vector.broadcast %cst_89 : f32 to vector<2x128xf32>
    %208 = arith.subf %207, %204 : vector<2x128xf32>
    %209 = arith.select %206, %204, %208 : vector<2x128xi1>, vector<2x128xf32>
    %cst_90 = arith.constant 1.000000e+00 : f32
    %210 = vector.broadcast %cst_90 : f32 to vector<2x128xf32>
    %211 = arith.addf %210, %209 : vector<2x128xf32>
    %212 = arith.mulf %171, %211 : vector<2x128xf32>
    %c0_91 = arith.constant 0 : index
    %c3_92 = arith.constant 3 : index
    %c0_93 = arith.constant 0 : index
    %c0_94 = arith.constant 0 : index
    %213 = vector.load %arg5[%c0_91, %c3_92, %c0_93, %c0_94] : memref<1x4x2x128xf32, #tpu.memory_space<vmem>>, vector<1x1x2x128xf32>
    %214 = vector.shape_cast %213 : vector<1x1x2x128xf32> to vector<2x128xf32>
    %215 = vector.shape_cast %212 : vector<2x128xf32> to vector<1x1x2x128xf32>
    tpu.vector_store %arg5[%c0_91, %c3_92, %c0_93, %c0_94], %215 {strides = array<i32>} : memref<1x4x2x128xf32, #tpu.memory_space<vmem>>, vector<1x1x2x128xf32>,
    return
  }
  func.func @transform_0(%arg0: i32, %arg1: i32) -> (i32, i32, i32, i32) {
    %c0_i32 = arith.constant 0 : i32
    %c0_i32_0 = arith.constant 0 : i32
    %c0_i32_1 = arith.constant 0 : i32
    return %arg0, %c0_i32, %arg1, %c0_i32_0 : i32, i32, i32, i32
  }
  func.func @transform_1(%arg0: i32, %arg1: i32) -> i32 {
    %c0_i32 = arith.constant 0 : i32
    %c0_i32_0 = arith.constant 0 : i32
    return %c0_i32 : i32
  }
  func.func @transform_2(%arg0: i32, %arg1: i32) -> i32 {
    %c0_i32 = arith.constant 0 : i32
    %c0_i32_0 = arith.constant 0 : i32
    return %c0_i32 : i32
  }
  func.func @transform_3(%arg0: i32, %arg1: i32) -> (i32, i32, i32, i32) {
    %c0_i32 = arith.constant 0 : i32
    %c0_i32_0 = arith.constant 0 : i32
    %c0_i32_1 = arith.constant 0 : i32
    return %arg0, %c0_i32, %arg1, %c0_i32_0 : i32, i32, i32, i32
  }
}

</mosaic_0001>

<bundles_post_ra>
// kernel: fno2d_block_forward.3
= control target key start
LH: loop header
LB: loop body
LE: loop exit
PB: predicated region body
PF: predicated region fallthrough
CT: control target
= control target key end

     0   :  { %v40_v0 = vlaneseq  ;;  %s345_s0 = inlined_call_operand.vmem [shape: f32[2,4,128], index: 0, kind: input, shape index: {}]   ;;  %s346_s1 = inlined_call_operand.vmem [shape: f32[2,4,128], index: 1, kind: input, shape index: {}]   ;;  %s347_s2 = inlined_call_operand.vmem [shape: f32[4,4,128], index: 2, kind: input, shape index: {}]   ;;  %s348_s3 = inlined_call_operand.vmem [shape: f32[4,4,128], index: 3, kind: input, shape index: {}]   ;;  %s349_s4 = inlined_call_operand.vmem [shape: f32[4,4,128], index: 4, kind: input, shape index: {}]   ;;  %s350_s5 = inlined_call_operand.vmem [shape: f32[2,4,128], index: 5, kind: output, shape index: {0}]   ;;  %s351_s6 = inlined_call_operand.vmem [shape: f32[2,4,128], index: 6, kind: output, shape index: {1}]  }
   0x1   :  { %v242_v1 = vld [vmem:[%s345_s0] sm:$0xf]  ;;  %v251_v5 = vld [vmem:[%s345_s0 + $0x4] sm:$0xf]  ;;  %v30_v13 = vld [vmem:[%s347_s2 + $0x8] sm:$0xf] }
   0x2   :  { %v24_v2 = vld [vmem:[%s346_s1] sm:$0xf]  ;;  %v41_v4 = vshrl.u32 %v40_v0, 7  ;;  %v25_v7 = vld [vmem:[%s346_s1 + $0x4] sm:$0xf] }
   0x3   :  { %v26_v3 = vadd.f32 %v24_v2, %v242_v1  ;;  %v28_v6 = vld [vmem:[%s347_s2] sm:$0xf]  ;;  %v29_v8 = vld [vmem:[%s347_s2 + $0x4] sm:$0xf]  ;;  %v27_v16 = vadd.f32 %v25_v7, %v251_v5  ;;  %v31_v17 = vld [vmem:[%s347_s2 + $0xc] sm:$0xf] }
   0x4   :  { %v262_v9 = vsub.s32 0, %v41_v4  ;;  %v264_v10 = vsub.s32 1, %v41_v4  ;;  %v266_v11 = vsub.s32 2, %v41_v4  ;;  %v268_v12 = vsub.s32 3, %v41_v4  ;;  %v32_v14 = vld [vmem:[%s348_s3] sm:$0xf] }
   0x5   :  { %v33_v15 = vld [vmem:[%s348_s3 + $0x4] sm:$0xf]  ;;  %v34_v18 = vld [vmem:[%s348_s3 + $0x8] sm:$0xf]  ;;  %v35_v19 = vld [vmem:[%s348_s3 + $0xc] sm:$0xf] }
   0x6   :  { %v43_v20 = vrot.slane %v26_v3, %v262_v9  ;;  %v63_v21 = vrot.slane %v24_v2, %v262_v9  ;;  %v81_v22 = vrot.slane %v26_v3, %v264_v10  ;;  %v101_v23 = vrot.slane %v24_v2, %v264_v10  ;;  %v36_v56 = vld [vmem:[%s349_s4] sm:$0xf]  ;;  %v37_v60 = vld [vmem:[%s349_s4 + $0x4] sm:$0xf]  ;;  %v38_v61 = vld [vmem:[%s349_s4 + $0x8] sm:$0xf] }
   0x7   :  { %v119_v24 = vrot.slane %v26_v3, %v266_v11  ;;  %v139_v25 = vrot.slane %v24_v2, %v266_v11  ;;  %v157_v26 = vrot.slane %v26_v3, %v268_v12  ;;  %v177_v27 = vrot.slane %v24_v2, %v268_v12  ;;  %v39_v2 = vld [vmem:[%s349_s4 + $0xc] sm:$0xf] }
   0x8   :  { %v48_v28 = vmul.f32 %v43_v20, %v28_v6  ;;  %v68_v29 = vmul.f32 %v63_v21, %v32_v14  ;;  %v86_v30 = vmul.f32 %v81_v22, %v29_v8  ;;  %v106_v31 = vmul.f32 %v101_v23, %v33_v15 }
   0x9   :  { %v124_v32 = vmul.f32 %v119_v24, %v30_v13  ;;  %v144_v33 = vmul.f32 %v139_v25, %v34_v18  ;;  %v162_v34 = vmul.f32 %v157_v26, %v31_v17  ;;  %v182_v35 = vmul.f32 %v177_v27, %v35_v19 }
   0xa   :  { %v70_v36 = vsub.f32 %v48_v28, %v68_v29  ;;  %v108_v37 = vsub.f32 %v86_v30, %v106_v31  ;;  %v47_v38 = vrot.slane %v27_v16, %v262_v9  ;;  %v67_v39 = vrot.slane %v25_v7, %v262_v9 }
   0xb   :  { %v146_v40 = vsub.f32 %v124_v32, %v144_v33  ;;  %v184_v41 = vsub.f32 %v162_v34, %v182_v35  ;;  %v85_v42 = vrot.slane %v27_v16, %v264_v10  ;;  %v105_v43 = vrot.slane %v25_v7, %v264_v10 }
   0xc   :  { %v110_v44 = vadd.f32 %v108_v37, %v70_v36  ;;  %v49_v45 = vmul.f32 %v47_v38, %v28_v6  ;;  %v69_v46 = vmul.f32 %v67_v39, %v32_v14  ;;  %v123_v47 = vrot.slane %v27_v16, %v266_v11 }
   0xd   :  { %v87_v48 = vmul.f32 %v85_v42, %v29_v8  ;;  %v107_v49 = vmul.f32 %v105_v43, %v33_v15  ;;  %v143_v50 = vrot.slane %v25_v7, %v266_v11  ;;  %v161_v51 = vrot.slane %v27_v16, %v268_v12 }
   0xe   :  { %v148_v52 = vadd.f32 %v146_v40, %v110_v44  ;;  %v71_v53 = vsub.f32 %v49_v45, %v69_v46  ;;  %v125_v54 = vmul.f32 %v123_v47, %v30_v13  ;;  %v181_v55 = vrot.slane %v25_v7, %v268_v12 }
   0xf   :  { %v109_v57 = vsub.f32 %v87_v48, %v107_v49  ;;  %v145_v58 = vmul.f32 %v143_v50, %v34_v18  ;;  %v163_v59 = vmul.f32 %v161_v51, %v31_v17  ;;  %v53_v62 = vrot.slane %v242_v1, %v262_v9 }
  0x10   :  { %v186_v63 = vadd.f32 %v184_v41, %v148_v52  ;;  %v183_v0 = vmul.f32 %v181_v55, %v35_v19  ;;  %v91_v3 = vrot.slane %v242_v1, %v264_v10  ;;  %v129_v4 = vrot.slane %v242_v1, %v266_v11 }
  0x11   :  { %v111_v6 = vadd.f32 %v109_v57, %v71_v53  ;;  %v147_v7 = vsub.f32 %v125_v54, %v145_v58  ;;  %v58_v8 = vmul.f32 %v53_v62, %v36_v56  ;;  %v167_v13 = vrot.slane %v242_v1, %v268_v12 }
  0x12   :  { %192 = vst [vmem:[%s350_s5] sm:$0xf] %v186_v63  ;;  %v185_v14 = vsub.f32 %v163_v59, %v183_v0  ;;  %v96_v15 = vmul.f32 %v91_v3, %v37_v60  ;;  %v134_v16 = vmul.f32 %v129_v4, %v38_v61  ;;  %v57_v17 = vrot.slane %v251_v5, %v262_v9 }
  0x13   :  { %v149_v18 = vadd.f32 %v147_v7, %v111_v6  ;;  %v74_v19 = vadd.f32 %v58_v8, %v48_v28  ;;  %v172_v20 = vmul.f32 %v167_v13, %v39_v2  ;;  %v95_v21 = vrot.slane %v251_v5, %v264_v10 }
  0x14   :  { %v112_v22 = vadd.f32 %v96_v15, %v86_v30  ;;  %v150_v23 = vadd.f32 %v134_v16, %v124_v32  ;;  %v59_v24 = vmul.f32 %v57_v17, %v36_v56  ;;  %v133_v1 = vrot.slane %v251_v5, %v266_v11 }
  0x15   :  { %v187_v25 = vadd.f32 %v185_v14, %v149_v18  ;;  %v97_v26 = vmul.f32 %v95_v21, %v37_v60  ;;  %v171_v27 = vrot.slane %v251_v5, %v268_v12  ;;  %v188_v31 = vadd.f32 %v172_v20, %v162_v34 }
  0x16   :  { %v114_v29 = vadd.f32 %v112_v22, %v74_v19  ;;  %v75_v9 = vadd.f32 %v59_v24, %v49_v45  ;;  %v135_v33 = vmul.f32 %v133_v1, %v38_v61 }
  0x17   :  { %193 = vst [vmem:[%s350_s5 + $0x4] sm:$0xf] %v187_v25  ;;  %v113_v10 = vadd.f32 %v97_v26, %v87_v48  ;;  %v173_v28 = vmul.f32 %v171_v27, %v39_v2 }
  0x18   :  { %v152_v30 = vadd.f32 %v150_v23, %v114_v29  ;;  %v151_v32 = vadd.f32 %v135_v33, %v125_v54 }
  0x19   :  { %v115_v35 = vadd.f32 %v113_v10, %v75_v9  ;;  %v189_v36 = vadd.f32 %v173_v28, %v163_v59 }
  0x1a   :  { %v190_v11 = vadd.f32 %v188_v31, %v152_v30 }
  0x1b   :  { %v153_v37 = vadd.f32 %v151_v32, %v115_v35 }
  0x1c   :  { %194 = vst [vmem:[%s351_s6] sm:$0xf] %v190_v11 }
  0x1d   :  { %v191_v5 = vadd.f32 %v189_v36, %v153_v37 }
  0x1f   :  { %195 = vst [vmem:[%s351_s6 + $0x4] sm:$0xf] %v191_v5 }

// kernel: reverse.0
= control target key start
LH: loop header
LB: loop body
LE: loop exit
PB: predicated region body
PF: predicated region fallthrough
CT: control target
= control target key end

     0   :  { %v72_v3 = vlaneseq  ;;  %v65_v9 = vld [vmem:[#allocation0 + $0x7] ss:$-1 sm:$0xff]  ;;  %v79_v12 = vld [vmem:[#allocation0 + $0x17] ss:$-1 sm:$0xff]  ;;  %s331_s0 = inlined_call_operand.vmem [shape: f32[2,4,16,7], index: 0, kind: input, shape index: {}]   ;;  %s332_s1 = inlined_call_operand.vmem [shape: f32[2,4,16,7], index: 1, kind: output, shape index: {}]  }
   0x1   :  { %v45_v0 = vld [vmem:[%s331_s0] sm:$0xff]  ;;  %v47_v1 = vld [vmem:[%s331_s0 + $0x8] sm:$0xff]  ;;  %v49_v2 = vld [vmem:[%s331_s0 + $0x10] sm:$0xff]  ;;  %v66_v10 = vrot.slane %v65_v9, 1  ;;  %v80_v14 = vrot.slane %v79_v12, 1 }
   0x2   :  { %46 = vst [vmem:[#allocation0 + $0x8] sm:$0xff] %v45_v0  ;;  %48 = vst [vmem:[#allocation0 + $0x18] sm:$0xff] %v47_v1  ;;  %v51_v4 = vld [vmem:[%s331_s0 + $0x18] sm:$0xff]  ;;  %v53_v5 = vld [vmem:[%s331_s0 + $0x20] sm:$0xff]  ;;  %v73_v11 = vshrl.u32 %v72_v3, 7 }
   0x3   :  { %50 = vst [vmem:[#allocation0 + $0x28] sm:$0xff] %v49_v2  ;;  %v55_v6 = vld [vmem:[%s331_s0 + $0x28] sm:$0xff]  ;;  %52 = vst [vmem:[#allocation0 + $0x38] sm:$0xff] %v51_v4  ;;  %v57_v7 = vld [vmem:[%s331_s0 + $0x30] sm:$0xff] }
   0x4   :  { %54 = vst [vmem:[#allocation0 + $0x48] sm:$0xff] %v53_v5  ;;  %56 = vst [vmem:[#allocation0 + $0x58] sm:$0xff] %v55_v6  ;;  %v59_v8 = vld [vmem:[%s331_s0 + $0x38] sm:$0xff]  ;;  %v93_v13 = vld [vmem:[#allocation0 + $0x27] ss:$-1 sm:$0xff]  ;;  %vm74_vm0 = vcmp.lt.s32.totalorder %v73_v11, 7 }
   0x5   :  { %58 = vst [vmem:[#allocation0 + $0x68] sm:$0xff] %v57_v7  ;;  %60 = vst [vmem:[#allocation0 + $0x78] sm:$0xff] %v59_v8  ;;  %v94_v15 = vrot.slane %v93_v13, 1  ;;  %v107_v16 = vld [vmem:[#allocation0 + $0x37] ss:$-1 sm:$0xff] }
   0x6   :  { %67 = vst [vmem:[#allocation1] sm:$0xff] %v66_v10  ;;  %v108_v17 = vrot.slane %v107_v16, 1  ;;  %v121_v18 = vld [vmem:[#allocation0 + $0x47] ss:$-1 sm:$0xff]  ;;  %v135_v19 = vld [vmem:[#allocation0 + $0x57] ss:$-1 sm:$0xff] }
   0x7   :  { %81 = vst [vmem:[#allocation1 + $0x8] sm:$0xff] %v80_v14  ;;  %95 = vst [vmem:[#allocation1 + $0x10] sm:$0xff] %v94_v15  ;;  %v122_v20 = vrot.slane %v121_v18, 1  ;;  %v136_v21 = vrot.slane %v135_v19, 1  ;;  %v149_v22 = vld [vmem:[#allocation0 + $0x67] ss:$-1 sm:$0xff] }
   0x8   :  { %v163_v23 = vld [vmem:[#allocation0 + $0x77] ss:$-1 sm:$0xff]  ;;  %109 = vst [vmem:[#allocation1 + $0x18] sm:$0xff] %v108_v17  ;;  %v150_v24 = vrot.slane %v149_v22, 1 }
   0x9   :  { %v164_v25 = vrot.slane %v163_v23, 1  ;;  %v70_v26 = vld [vmem:[#allocation0 + $0xf] ss:$-1 sm:$0xff]  ;;  %v84_v27 = vld [vmem:[#allocation0 + $0x1f] ss:$-1 sm:$0xff]  ;;  %123 = vst [vmem:[#allocation1 + $0x20] sm:$0xff] %v122_v20 }
   0xa   :  { %v98_v28 = vld [vmem:[#allocation0 + $0x2f] ss:$-1 sm:$0xff]  ;;  %137 = vst [vmem:[#allocation1 + $0x28] sm:$0xff] %v136_v21  ;;  %v71_v29 = vrot.slane %v70_v26, 1  ;;  %v85_v30 = vrot.slane %v84_v27, 1  ;;  %151 = vst [vmem:[#allocation1 + $0x30] sm:$0xff] %v150_v24 }
   0xb   :  { %v99_v31 = vrot.slane %v98_v28, 1  ;;  %v112_v32 = vld [vmem:[#allocation0 + $0x3f] ss:$-1 sm:$0xff]  ;;  %165 = vst [vmem:[#allocation1 + $0x38] sm:$0xff] %v164_v25  ;;  %v126_v34 = vld [vmem:[#allocation0 + $0x4f] ss:$-1 sm:$0xff] }
   0xc   :  { %v113_v33 = vrot.slane %v112_v32, 1  ;;  %v140_v35 = vld [vmem:[#allocation0 + $0x5f] ss:$-1 sm:$0xff]  ;;  %75 = vst.msk [vmem:[#allocation1] sm:$0xff] %vm74_vm0, %v71_v29  ;;  %89 = vst.msk [vmem:[#allocation1 + $0x8] sm:$0xff] %vm74_vm0, %v85_v30  ;;  %v127_v36 = vrot.slane %v126_v34, 1 }
   0xd   :  { %103 = vst.msk [vmem:[#allocation1 + $0x10] sm:$0xff] %vm74_vm0, %v99_v31  ;;  %v141_v37 = vrot.slane %v140_v35, 1  ;;  %v154_v38 = vld [vmem:[#allocation0 + $0x6f] ss:$-1 sm:$0xff]  ;;  %v168_v39 = vld [vmem:[#allocation0 + $0x7f] ss:$-1 sm:$0xff] }
   0xe   :  { %117 = vst.msk [vmem:[#allocation1 + $0x18] sm:$0xff] %vm74_vm0, %v113_v33  ;;  %v155_v40 = vrot.slane %v154_v38, 1  ;;  %v169_v41 = vrot.slane %v168_v39, 1  ;;  %131 = vst.msk [vmem:[#allocation1 + $0x20] sm:$0xff] %vm74_vm0, %v127_v36 }
   0xf   :  { %145 = vst.msk [vmem:[#allocation1 + $0x28] sm:$0xff] %vm74_vm0, %v141_v37 }
  0x10   :  { %159 = vst.msk [vmem:[#allocation1 + $0x30] sm:$0xff] %vm74_vm0, %v155_v40  ;;  %173 = vst.msk [vmem:[#allocation1 + $0x38] sm:$0xff] %vm74_vm0, %v169_v41 }
  0x13   :  { %v216_v42 = vld [vmem:[#allocation1] sm:$0xff]  ;;  %v218_v43 = vld [vmem:[#allocation1 + $0x8] sm:$0xff] }
  0x14   :  { %v220_v44 = vld [vmem:[#allocation1 + $0x10] sm:$0xff]  ;;  %217 = vst [vmem:[%s332_s1] sm:$0xff] %v216_v42  ;;  %219 = vst [vmem:[%s332_s1 + $0x8] sm:$0xff] %v218_v43 }
  0x15   :  { %221 = vst [vmem:[%s332_s1 + $0x10] sm:$0xff] %v220_v44  ;;  %v222_v45 = vld [vmem:[#allocation1 + $0x18] sm:$0xff]  ;;  %v224_v46 = vld [vmem:[#allocation1 + $0x20] sm:$0xff] }
  0x16   :  { %223 = vst [vmem:[%s332_s1 + $0x18] sm:$0xff] %v222_v45  ;;  %v226_v47 = vld [vmem:[#allocation1 + $0x28] sm:$0xff]  ;;  %225 = vst [vmem:[%s332_s1 + $0x20] sm:$0xff] %v224_v46 }
  0x17   :  { %227 = vst [vmem:[%s332_s1 + $0x28] sm:$0xff] %v226_v47  ;;  %v228_v48 = vld [vmem:[#allocation1 + $0x30] sm:$0xff]  ;;  %v230_v49 = vld [vmem:[#allocation1 + $0x38] sm:$0xff] }
  0x18   :  { %229 = vst [vmem:[%s332_s1 + $0x30] sm:$0xff] %v228_v48  ;;  %231 = vst [vmem:[%s332_s1 + $0x38] sm:$0xff] %v230_v49 }

// kernel: fno2d_block_forward.4
= control target key start
LH: loop header
LB: loop body
LE: loop exit
PB: predicated region body
PF: predicated region fallthrough
CT: control target
= control target key end

     0   :  { %11 = vsyncpa [#allocation3], 0  ;;  %s850_s18 = smov 0   ;;  %s852_s19 = smov 0   ;;  %s1010_s0 = inlined_call_operand.vmem [shape: f32[2,4,2,128], index: 0, kind: input, shape index: {}]   ;;  %s1011_s1 = inlined_call_operand.vmem [shape: f32[4,4], index: 1, kind: input, shape index: {}]   ;;  %s1012_s2 = inlined_call_operand.vmem [shape: f32[2,4,2,128], index: 2, kind: input, shape index: {}]   ;;  %s1013_s3 = inlined_call_operand.vmem [shape: f32[2,4,2,128], index: 3, kind: output, shape index: {0}]   ;;  %s1014_s4 = inlined_call_operand.vmem [shape: f32[2,4,128], index: 4, kind: output, shape index: {1}]   ;;  %s1015_s5 = inlined_call_operand.vmem [shape: f32[2,4,128], index: 5, kind: output, shape index: {2}]  }
   0x1   :  { %s854_s20 = smov 0  }
   0x2 LB: > { %s686_s21 = sadd.s32 4294967295, %s816_s20   ;;  %s29_s22 = sadd.s32 1, %s812_s19  ;;  %s816_s20 = sphi %s854_s20, %s17_s20   ;;  %s812_s19 = sphi %s852_s19, %s1019_s19   ;;  %s808_s18 = sphi %s850_s18, %s1018_s18  }
   0x3   : > { %p31_p0 = scmp.ge.s32.totalorder %s29_s22, 2  ;;  %p688_p1 = scmp.ge.s32.totalorder %s816_s20, 1 }
   0x4   : > { %p191_p2 = scmp.lt.s32.totalorder %s816_s20, 3  ;;  %p875_p4 = scmp.eq.s32.totalorder %s686_s21, 0 }
   0x5   : > { %s1021_s22 = smov (%p31_p0, %s29_s22), 0  ;;  %s204_s27 = sshll.u32 %s1011_s1, 4  ;;  %s205_s27 = int_to_ptr.vmem [resolvable:$true] %s204_s27 }
   0x6   : > { %p871_p3 = pnand %p688_p1, %p191_p2  ;;  %s775_s28 = scalar_lea.vmem %s205_s27, 64 }
   0x7   : > { %p776_p7 = scmp.ne.s32.totalorder %s205_s27, %s775_s28  ;;  %p783_p11 = scmp.lt.s32.totalorder %s205_s27, %s205_s27 }
   0x8   : > { %p743_p5 = pneg %p871_p3  ;;  %p784_p12 = scmp.lt.s32.totalorder %s775_s28, %s775_s28 }
   0xa   : > { %p744_p6 = pnand %p875_p4, %p743_p5  ;;  %p785_p13 = por %p784_p12, %p783_p11 }
   0xc   : > { %p777_p8 = pneg %p744_p6 }
   0xe   : > { %p778_p9 = pnand %p777_p8, %p776_p7 }
  0x10   : > { %p779_p10 = pneg %p778_p9 }
  0x12   : > { %p786_p0 = pnand %p785_p13, %p779_p10 }
  0x14   : > { %789 = shalt.err (!%p786_p0)
}
  0x15   : > { %s818_s29 = smov [#allocation2]   ;;  %239 = sbr.rel (%p871_p3) target bundleno = 82 (0x52), region = 32 }
  0x16   : > { %746 = dma.vmem_to_smem (!%p744_p6), %s205_s27, 64, %s818_s29, [#allocation3]  }
  0x1a   : > { %803 = dma.done.wait (%p875_p4), [#allocation3], 64  }
  0x1b   : > { %805 = vsyncadd (%p875_p4), [#allocation3], 4294967232 }
  0x1c   : > { %245 = sfence }
  0x1d   : > { %p290_p1 = scmp.lt.s32.totalorder %s808_s18, 1  ;;  %s329_s30 = sld [smem:[#allocation2]]  ;;  %v819_v0 = vmov 0.0   ;;  %vm354_vm0 = vcmask 1041408  }
  0x1e   : > { %s701_s6 = sld [smem:[#allocation2 + $0x1]] }
  0x1f   : > { %s1023_s18 = smov (!%p290_p1, %s808_s18), 1  ;;  %s703_s7 = sld [smem:[#allocation2 + $0x2]] }
  0x20   : > { %s699_s8 = sshll.u32 %s1023_s18, 2  ;;  %s894_s9 = sshll.u32 %s1023_s18, 3 }
  0x21   : > { %s899_s12 = scalar_lea.vmem %s1014_s4, %s699_s8  ;;  %s904_s15 = scalar_lea.vmem %s1015_s5, %s699_s8 }
  0x22   : > { %326 = vst [vmem:[%s899_s12] sm:$0xf] %v819_v0  ;;  %327 = vst [vmem:[%s904_s15] sm:$0xf] %v819_v0  ;;  %s912_s18 = scalar_lea.vmem %s1010_s0, %s894_s9  ;;  %s918_s24 = scalar_lea.vmem %s1012_s2, %s894_s9 }
  0x23   : > { %v331_v1 = vstv %s329_s30  ;;  %v328_v2 = vld [vmem:[%s918_s24] sm:$0x3]  ;;  %v702_v4 = vld [vmem:[%s912_s18 + $0x2] sm:$0x3]  ;;  %v704_v8 = vld [vmem:[%s912_s18 + $0x4] sm:$0x3]  ;;  %s939_s10 = scalar_lea.vmem %s1013_s3, %s894_s9 }
  0x24   : > { %v330_v3 = vld [vmem:[%s912_s18] sm:$0x3]  ;;  %v337_v5 = vstv %s701_s6  ;;  %s705_s25 = sld [smem:[#allocation2 + $0x3]]  ;;  %v706_v13 = vld [vmem:[%s912_s18 + $0x6] sm:$0x3] }
  0x25   : > { %v332_v6 = vmul.f32 %v331_v1, %v330_v3  ;;  %v338_v7 = vmul.f32 %v702_v4, %v337_v5  ;;  %v343_v9 = vstv %s703_s7  ;;  %s708_s26 = sld [smem:[#allocation2 + $0x80]]  ;;  %v378_v14 = vld [vmem:[%s912_s18] sm:$0x3]  ;;  %v710_v17 = vld [vmem:[%s912_s18 + $0x2] sm:$0x3] }
  0x26   : > { %v344_v11 = vmul.f32 %v704_v8, %v343_v9  ;;  %s709_s27 = sld [smem:[#allocation2 + $0x81]]  ;;  %v707_v19 = vld [vmem:[%s918_s24 + $0x2] sm:$0x3]  ;;  %v712_v21 = vld [vmem:[%s912_s18 + $0x4] sm:$0x3] }
  0x27   : > { %v333_v10 = vadd.f32 %v332_v6, %v328_v2  ;;  %s711_s28 = sld [smem:[#allocation2 + $0x82]]  ;;  %v714_v27 = vld [vmem:[%s912_s18 + $0x6] sm:$0x3]  ;;  %v423_v31 = vld [vmem:[%s912_s18] sm:$0x3] }
  0x28   : > { %s925_s29 = sld [smem:[#allocation2 + $0x83]]  ;;  %v719_v34 = vld [vmem:[%s912_s18 + $0x2] sm:$0x3]  ;;  %v716_v38 = vld [vmem:[%s918_s24 + $0x4] sm:$0x3] }
  0x29   : > { %v339_v12 = vadd.f32 %v338_v7, %v333_v10  ;;  %s929_s30 = sld [smem:[#allocation2 + $0x100]]  ;;  %v721_v43 = vld [vmem:[%s912_s18 + $0x4] sm:$0x3]  ;;  %v723_v48 = vld [vmem:[%s912_s18 + $0x6] sm:$0x3] }
  0x2a   : > { %v349_v16 = vstv %s705_s25  ;;  %s933_s6 = sld [smem:[#allocation2 + $0x101]]  ;;  %v468_v56 = vld [vmem:[%s912_s18] sm:$0x3]  ;;  %v728_v57 = vld [vmem:[%s912_s18 + $0x2] sm:$0x3] }
  0x2b   : > { %v345_v15 = vadd.f32 %v344_v11, %v339_v12  ;;  %v350_v18 = vmul.f32 %v706_v13, %v349_v16  ;;  %v379_v20 = vstv %s708_s26  ;;  %s941_s11 = sld [smem:[#allocation2 + $0x102]]  ;;  %v725_v2 = vld [vmem:[%s918_s24 + $0x6] sm:$0x3]  ;;  %v730_v7 = vld [vmem:[%s912_s18 + $0x4] sm:$0x3] }
  0x2c   : > { %v380_v22 = vmul.f32 %v379_v20, %v378_v14  ;;  %v384_v23 = vstv %s709_s27  ;;  %s944_s13 = sld [smem:[#allocation2 + $0x103]]  ;;  %v353_v12 = vld [vmem:[%s899_s12] sm:$0x1]  ;;  %v732_v20 = vld [vmem:[%s912_s18 + $0x6] sm:$0x3] }
  0x2d   : > { %v351_v24 = vadd.f32 %v350_v18, %v345_v15  ;;  %v385_v25 = vmul.f32 %v710_v17, %v384_v23  ;;  %v389_v26 = vstv %s711_s28  ;;  %s948_s9 = sld [smem:[#allocation2 + $0x180]] }
  0x2e   : > { %v381_v28 = vadd.f32 %v707_v19, %v380_v22  ;;  %v390_v29 = vmul.f32 %v712_v21, %v389_v26  ;;  %v394_v30 = vstv %s925_s29  ;;  %s953_s14 = sld [smem:[#allocation2 + $0x181]]  ;;  %v364_v22 = vld [vmem:[%s904_s15] sm:$0x1] }
  0x2f   : > { %352 = vst [vmem:[%s939_s10] sm:$0x3] %v351_v24  ;;  %v355_v32 = vsel %vm354_vm0, %v351_v24, 0.0  ;;  %v365_v33 = vmul.f32 %v351_v24, %v351_v24  ;;  %v395_v37 = vmul.f32 %v714_v27, %v394_v30  ;;  %v424_v39 = vstv %s929_s30  ;;  %s957_s16 = sld [smem:[#allocation2 + $0x182]] }
  0x30   : > { %v356_v35 = vrot.slane %v355_v32, 4  ;;  %v386_v36 = vadd.f32 %v385_v25, %v381_v28  ;;  %v425_v41 = vmul.f32 %v424_v39, %v423_v31  ;;  %v429_v42 = vstv %s933_s6  ;;  %s963_s17 = sld [smem:[#allocation2 + $0x183]] }
  0x31   : > { %v366_v40 = vsel %vm354_vm0, %v365_v33, 0.0  ;;  %v430_v47 = vmul.f32 %v719_v34, %v429_v42  ;;  %v434_v50 = vstv %s941_s11 }
  0x32   : > { %v357_v44 = vadd.f32 %v356_v35, %v355_v32  ;;  %v367_v45 = vrot.slane %v366_v40, 4  ;;  %v391_v46 = vadd.f32 %v390_v29, %v386_v36  ;;  %v426_v49 = vadd.f32 %v716_v38, %v425_v41  ;;  %v399_v41 = vld [vmem:[%s899_s12 + $0x1] sm:$0x1] }
  0x33   : > { %v439_v51 = vstv %s944_s13  ;;  %v435_v55 = vmul.f32 %v721_v43, %v434_v50  ;;  %v469_v60 = vstv %s948_s9 }
  0x34   : > { %v358_v52 = vrot.slane %v357_v44, 2  ;;  %v368_v53 = vadd.f32 %v367_v45, %v366_v40  ;;  %v396_v54 = vadd.f32 %v395_v37, %v391_v46  ;;  %v431_v58 = vadd.f32 %v430_v47, %v426_v49  ;;  %v409_v47 = vld [vmem:[%s904_s15 + $0x1] sm:$0x1] }
  0x35   : > { %v440_v59 = vmul.f32 %v723_v48, %v439_v51  ;;  %v474_v61 = vstv %s953_s14  ;;  %v470_v5 = vmul.f32 %v469_v60, %v468_v56  ;;  %v479_v11 = vstv %s957_s16 }
  0x36   : > { %v359_v62 = vadd.f32 %v358_v52, %v357_v44  ;;  %v369_v63 = vrot.slane %v368_v53, 2  ;;  %715 = vst [vmem:[%s939_s10 + $0x2] sm:$0x3] %v396_v54  ;;  %v400_v0 = vsel %vm354_vm0, %v396_v54, 0.0  ;;  %v410_v1 = vmul.f32 %v396_v54, %v396_v54 }
  0x37   : > { %v401_v3 = vrot.slane %v400_v0, 4  ;;  %v436_v4 = vadd.f32 %v435_v55, %v431_v58  ;;  %v475_v6 = vmul.f32 %v728_v57, %v474_v61  ;;  %v471_v16 = vadd.f32 %v725_v2, %v470_v5 }
  0x38   : > { %v360_v8 = vrot.slane %v359_v62, 1  ;;  %v370_v9 = vadd.f32 %v369_v63, %v368_v53  ;;  %v411_v10 = vsel %vm354_vm0, %v410_v1, 0.0  ;;  %v480_v19 = vmul.f32 %v730_v7, %v479_v11 }
  0x39   : > { %v402_v13 = vadd.f32 %v401_v3, %v400_v0  ;;  %v412_v14 = vrot.slane %v411_v10, 4  ;;  %v441_v15 = vadd.f32 %v440_v59, %v436_v4  ;;  %v484_v21 = vstv %s963_s17  ;;  %v444_v59 = vld [vmem:[%s899_s12 + $0x2] sm:$0x1] }
  0x3a   : > { %v361_v17 = vadd.f32 %v360_v8, %v359_v62  ;;  %v371_v18 = vrot.slane %v370_v9, 1  ;;  %v476_v30 = vadd.f32 %v475_v6, %v471_v16  ;;  %v485_v34 = vmul.f32 %v732_v20, %v484_v21  ;;  %v454_v0 = vld [vmem:[%s904_s15 + $0x2] sm:$0x1] }
  0x3b   : > { %v403_v23 = vrot.slane %v402_v13, 2  ;;  %v413_v24 = vadd.f32 %v412_v14, %v411_v10  ;;  %724 = vst [vmem:[%s939_s10 + $0x4] sm:$0x3] %v441_v15  ;;  %v445_v25 = vsel %vm354_vm0, %v441_v15, 0.0  ;;  %v455_v26 = vmul.f32 %v441_v15, %v441_v15  ;;  %v489_v10 = vld [vmem:[%s899_s12 + $0x3] sm:$0x1] }
  0x3c   : > { %v362_v27 = vadd.f32 %v361_v17, %v353_v12  ;;  %v372_v28 = vadd.f32 %v371_v18, %v370_v9  ;;  %v446_v29 = vrot.slane %v445_v25, 4  ;;  %v481_v38 = vadd.f32 %v480_v19, %v476_v30 }
  0x3d   : > { %v404_v31 = vadd.f32 %v403_v23, %v402_v13  ;;  %v414_v32 = vrot.slane %v413_v24, 2  ;;  %v456_v33 = vsel %vm354_vm0, %v455_v26, 0.0  ;;  %v499_v13 = vld [vmem:[%s904_s15 + $0x3] sm:$0x1] }
  0x3e   : > { %363 = vst [vmem:[%s899_s12] sm:$0x1] %v362_v27  ;;  %v373_v35 = vadd.f32 %v372_v28, %v364_v22  ;;  %v447_v36 = vadd.f32 %v446_v29, %v445_v25  ;;  %v457_v37 = vrot.slane %v456_v33, 4  ;;  %v486_v44 = vadd.f32 %v485_v34, %v481_v38 }
  0x3f   : > { %v405_v39 = vrot.slane %v404_v31, 1  ;;  %v415_v40 = vadd.f32 %v414_v32, %v413_v24 }
  0x40   : > { %374 = vst [vmem:[%s904_s15] sm:$0x1] %v373_v35  ;;  %v448_v42 = vrot.slane %v447_v36, 2  ;;  %v458_v43 = vadd.f32 %v457_v37, %v456_v33  ;;  %733 = vst [vmem:[%s939_s10 + $0x6] sm:$0x3] %v486_v44  ;;  %v490_v50 = vsel %vm354_vm0, %v486_v44, 0.0  ;;  %v500_v51 = vmul.f32 %v486_v44, %v486_v44 }
  0x41   : > { %v406_v45 = vadd.f32 %v405_v39, %v404_v31  ;;  %v416_v46 = vrot.slane %v415_v40, 1  ;;  %v491_v54 = vrot.slane %v490_v50, 4 }
  0x42   : > { %v449_v48 = vadd.f32 %v448_v42, %v447_v36  ;;  %v459_v49 = vrot.slane %v458_v43, 2  ;;  %v501_v57 = vsel %vm354_vm0, %v500_v51, 0.0 }
  0x43   : > { %v407_v52 = vadd.f32 %v406_v45, %v399_v41  ;;  %v417_v53 = vadd.f32 %v416_v46, %v415_v40  ;;  %v492_v60 = vadd.f32 %v491_v54, %v490_v50  ;;  %v502_v61 = vrot.slane %v501_v57, 4 }
  0x44   : > { %v450_v55 = vrot.slane %v449_v48, 1  ;;  %v460_v56 = vadd.f32 %v459_v49, %v458_v43 }
  0x45   : > { %408 = vst [vmem:[%s899_s12 + $0x1] sm:$0x1] %v407_v52  ;;  %v418_v58 = vadd.f32 %v417_v53, %v409_v47  ;;  %v493_v1 = vrot.slane %v492_v60, 2  ;;  %v503_v2 = vadd.f32 %v502_v61, %v501_v57 }
  0x46   : > { %v451_v62 = vadd.f32 %v450_v55, %v449_v48  ;;  %v461_v63 = vrot.slane %v460_v56, 1 }
  0x47   : > { %419 = vst [vmem:[%s904_s15 + $0x1] sm:$0x1] %v418_v58  ;;  %v494_v5 = vadd.f32 %v493_v1, %v492_v60  ;;  %v504_v6 = vrot.slane %v503_v2, 2 }
  0x48   : > { %v452_v3 = vadd.f32 %v451_v62, %v444_v59  ;;  %v462_v4 = vadd.f32 %v461_v63, %v460_v56 }
  0x49   : > { %v495_v8 = vrot.slane %v494_v5, 1  ;;  %v505_v9 = vadd.f32 %v504_v6, %v503_v2 }
  0x4a   : > { %453 = vst [vmem:[%s899_s12 + $0x2] sm:$0x1] %v452_v3  ;;  %v463_v7 = vadd.f32 %v462_v4, %v454_v0 }
  0x4b   : > { %v496_v11 = vadd.f32 %v495_v8, %v494_v5  ;;  %v506_v12 = vrot.slane %v505_v9, 1 }
  0x4c   : > { %464 = vst [vmem:[%s904_s15 + $0x2] sm:$0x1] %v463_v7 }
  0x4d   : > { %v497_v14 = vadd.f32 %v496_v11, %v489_v10  ;;  %v507_v15 = vadd.f32 %v506_v12, %v505_v9 }
  0x4f   : > { %498 = vst [vmem:[%s899_s12 + $0x3] sm:$0x1] %v497_v14  ;;  %v508_v16 = vadd.f32 %v507_v15, %v499_v13 }
  0x51   : > { %509 = vst [vmem:[%s904_s15 + $0x3] sm:$0x1] %v508_v16 }
  0x52 PF: > { %s17_s20 = sadd.s32 1, %s816_s20   ;;  %s1018_s18 = smov %s812_s19 }
  0x53   : > { %p14_p2 = scmp.ge.s32.totalorder %s17_s20, 4   ;;  %s1019_s19 = smov %s1021_s22 }
  0x55   :  { %16 = sbr.rel (!%p14_p2) target bundleno = 2 (0x2), region = 107 }
  0x5a   :  { %565 = vsyncpa [#allocation3], 1 }
  0x5b   :  { %567 = vsyncpa [#allocation3 + $0x1], 1 }

// kernel: fno2d_block_forward.5
= control target key start
LH: loop header
LB: loop body
LE: loop exit
PB: predicated region body
PF: predicated region fallthrough
CT: control target
= control target key end

     0   :  { %8 = vsyncpa [#allocation3], 0  ;;  %s786_s0 = inlined_call_operand.vmem [shape: f32[2,4,2,128], index: 0, kind: input, shape index: {}]   ;;  %s787_s1 = inlined_call_operand.vmem [shape: f32[4], index: 1, kind: input, shape index: {}]   ;;  %s788_s2 = inlined_call_operand.vmem [shape: f32[4], index: 2, kind: input, shape index: {}]   ;;  %s789_s3 = inlined_call_operand.vmem [shape: f32[2,4,2,128], index: 3, kind: output, shape index: {}]  }
   0x1   :  { %9 = vsyncpa [#allocation5], 0  ;;  %s663_s12 = smov 0   ;;  %s665_s13 = smov 0  }
   0x2   :  { %s667_s14 = smov 0  }
   0x3 LB: > { %s489_s15 = sadd.s32 4294967295, %s639_s14   ;;  %s27_s16 = sadd.s32 1, %s635_s13  ;;  %s639_s14 = sphi %s667_s14, %s15_s14   ;;  %s635_s13 = sphi %s665_s13, %s799_s13   ;;  %s631_s12 = sphi %s663_s12, %s798_s12  }
   0x4   : > { %p29_p0 = scmp.ge.s32.totalorder %s27_s16, 2  ;;  %p491_p1 = scmp.ge.s32.totalorder %s639_s14, 1 }
   0x5   : > { %p130_p2 = scmp.lt.s32.totalorder %s639_s14, 3  ;;  %p688_p4 = scmp.eq.s32.totalorder %s489_s15, 0 }
   0x6   : > { %s801_s16 = smov (%p29_p0, %s27_s16), 0  ;;  %s143_s21 = sshll.u32 %s787_s1, 4  ;;  %s144_s21 = int_to_ptr.vmem [resolvable:$true] %s143_s21 }
   0x7   : > { %p684_p3 = pnand %p491_p1, %p130_p2  ;;  %s154_s24 = sshll.u32 %s788_s2, 4  ;;  %s155_s24 = int_to_ptr.vmem [resolvable:$true] %s154_s24 }
   0x8   : > { %s794_s18 = scalar_select %p688_p4, 1, 0 }
   0x9   : > { %s793_s17 = scalar_select %p684_p3, 1, 0 }
   0xa   : > { %p526_p5 = pneg %p684_p3  ;;  %s579_s26 = scalar_lea.vmem %s144_s21, 16 }
   0xb   : > { %p580_p7 = scmp.ne.s32.totalorder %s144_s21, %s579_s26  ;;  %p587_p11 = scmp.lt.s32.totalorder %s144_s21, %s144_s21 }
   0xc   : > { %p702_p6 = pnand %p688_p4, %p526_p5  ;;  %p588_p12 = scmp.lt.s32.totalorder %s579_s26, %s579_s26 }
   0xe   : > { %p581_p8 = pneg %p702_p6  ;;  %p589_p13 = por %p588_p12, %p587_p11 }
  0x10   : > { %p582_p9 = pnand %p581_p8, %p580_p7 }
  0x12   : > { %p583_p10 = pneg %p582_p9 }
  0x14   : > { %p590_p0 = pnand %p589_p13, %p583_p10 }
  0x16   : > { %593 = shalt.err (!%p590_p0)
}
  0x17   : > { %s641_s27 = smov [#allocation2]   ;;  %s594_s28 = scalar_lea.vmem %s155_s24, 16 }
  0x18   : > { %529 = dma.vmem_to_smem (!%p702_p6), %s144_s21, 16, %s641_s27, [#allocation3]  }
  0x19   : > { %p595_p1 = scmp.ne.s32.totalorder %s155_s24, %s594_s28  ;;  %p602_p4 = scmp.lt.s32.totalorder %s155_s24, %s155_s24 }
  0x1a   : > { %p603_p3 = scmp.lt.s32.totalorder %s594_s28, %s594_s28 }
  0x1b   : > { %p597_p2 = pnand %p595_p1, %p581_p8 }
  0x1c   : > { %p604_p7 = por %p603_p3, %p602_p4 }
  0x1d   : > { %p598_p5 = pneg %p597_p2 }
  0x1f   : > { %p605_p9 = pnand %p604_p7, %p598_p5 }
  0x21   : > { %608 = shalt.err (!%p605_p9)
}
  0x22   : > { %s642_s29 = smov [#allocation4]   ;;  %p796_p10 = scmp.ne.s32.totalorder %s793_s17, 0 }
  0x23   : > { %532 = dma.vmem_to_smem (!%p702_p6), %s155_s24, 16, %s642_s29, [#allocation5]  }
  0x24   : > { %178 = sbr.rel (%p796_p10) target bundleno = 122 (0x7a), region = 32  ;;  %p797_p11 = scmp.ne.s32.totalorder (!%p796_p10), %s794_s18, 0 }
  0x29   : > { %622 = dma.done.wait (%p797_p11), [#allocation3], 16  }
  0x2a   : > { %624 = vsyncadd (%p797_p11), [#allocation3], 4294967280 }
  0x2b   : > { %626 = dma.done.wait (%p797_p11), [#allocation5], 16  }
  0x2c   : > { %628 = vsyncadd (%p797_p11), [#allocation5], 4294967280 }
  0x2d   : > { %188 = sfence }
  0x2e   : > { %p213_p3 = scmp.lt.s32.totalorder %s631_s12, 1  ;;  %s230_s30 = sld [smem:[#allocation2]] }
  0x2f   : > { %s233_s4 = sld [smem:[#allocation4]] }
  0x30   : > { %s803_s12 = smov (!%p213_p3, %s631_s12), 1  ;;  %s503_s5 = sld [smem:[#allocation2 + $0x1]] }
  0x31   : > { %s516_s6 = sshll.u32 %s803_s12, 3  ;;  %s504_s7 = sld [smem:[#allocation4 + $0x1]] }
  0x32   : > { %s220_s10 = scalar_lea.vmem %s786_s0, %s516_s6  ;;  %s507_s11 = sld [smem:[#allocation2 + $0x2]] }
  0x33   : > { %v229_v0 = vld [vmem:[%s220_s10] sm:$0x3]  ;;  %v502_v4 = vld [vmem:[%s220_s10 + $0x2] sm:$0x3]  ;;  %s508_s15 = sld [smem:[#allocation4 + $0x2]]  ;;  %s228_s21 = scalar_lea.vmem %s789_s3, %s516_s6 }
  0x34   : > { %v231_v1 = vstv %s230_s30  ;;  %s511_s17 = sld [smem:[#allocation2 + $0x3]]  ;;  %v506_v10 = vld [vmem:[%s220_s10 + $0x4] sm:$0x3]  ;;  %v510_v17 = vld [vmem:[%s220_s10 + $0x6] sm:$0x3] }
  0x35   : > { %v232_v2 = vmul.f32 %v231_v1, %v229_v0  ;;  %v234_v3 = vstv %s233_s4  ;;  %s512_s18 = sld [smem:[#allocation4 + $0x3]] }
  0x36   : > { %v269_v6 = vstv %s503_s5 }
  0x37   : > { %v732_v5 = vadd.f32 %v234_v3, %v232_v2  ;;  %v270_v7 = vmul.f32 %v502_v4, %v269_v6  ;;  %v272_v8 = vstv %s504_s7 }
  0x38   : > { %v308_v13 = vstv %s507_s11 }
  0x39   : > { %v735_v9 = vmul.f32 0.70710677, %v732_v5  ;;  %v737_v11 = vadd.f32 %v272_v8, %v270_v7  ;;  %v309_v15 = vmul.f32 %v506_v10, %v308_v13  ;;  %v311_v16 = vstv %s508_s15 }
  0x3a   : > { %v347_v19 = vstv %s511_s17 }
  0x3b   : > { %v238_v12 = vand.u32 2147483647, %v735_v9  ;;  %v741_v14 = vmul.f32 0.70710677, %v737_v11  ;;  %v744_v21 = vadd.f32 %v311_v16, %v309_v15  ;;  %v348_v23 = vmul.f32 %v510_v17, %v347_v19 }
  0x3c   : > { %v350_v24 = vstv %s512_s18  ;;  %v254_v36 = vmul.f32 %v735_v9, %v735_v9  ;;  %vm260_vm0 = vcmp.ge.f32.partialorder %v735_v9, 0.0  ;;  %v274_v9 = vmul.f32 0.5, %v737_v11 }
  0x3d   : > { %v239_v18 = vmul.f32 0.3275911, %v238_v12  ;;  %v276_v20 = vand.u32 2147483647, %v741_v14  ;;  %v747_v26 = vmul.f32 0.70710677, %v744_v21  ;;  %v749_v27 = vadd.f32 %v350_v24, %v348_v23 }
  0x3e   : > { %v292_v38 = vmul.f32 %v741_v14, %v741_v14  ;;  %v255_v40 = vsub.f32 0.0, %v254_v36  ;;  %vm298_vm1 = vcmp.ge.f32.partialorder %v741_v14, 0.0 }
  0x3f   : > { %v240_v22 = vadd.f32 1.0, %v239_v18  ;;  %v277_v25 = vmul.f32 0.3275911, %v276_v20  ;;  %v315_v29 = vand.u32 2147483647, %v747_v26  ;;  %v331_v45 = vmul.f32 %v747_v26, %v747_v26 }
  0x40   : > { %v753_v30 = vmul.f32 0.70710677, %v749_v27  ;;  %v293_v44 = vsub.f32 0.0, %v292_v38  ;;  %v256_v47 = vmul.f32 1.442695, %v255_v40  ;;  %vm337_vm2 = vcmp.ge.f32.partialorder %v747_v26, 0.0 }
  0x41   : > { %563 = vrcp.f32 %v240_v22  ;;  %v278_v28 = vadd.f32 1.0, %v277_v25  ;;  %v316_v31 = vmul.f32 0.3275911, %v315_v29  ;;  %v332_v55 = vsub.f32 0.0, %v331_v45 }
  0x42   : > { %v354_v32 = vand.u32 2147483647, %v753_v30  ;;  %v370_v51 = vmul.f32 %v753_v30, %v753_v30  ;;  %v294_v53 = vmul.f32 1.442695, %v293_v44  ;;  %vm376_vm3 = vcmp.ge.f32.partialorder %v753_v30, 0.0 }
  0x43   : > { %565 = vrcp.f32 %v278_v28  ;;  %v317_v33 = vadd.f32 1.0, %v316_v31  ;;  %v333_v1 = vmul.f32 1.442695, %v332_v55 }
  0x44   : > { %v355_v34 = vmul.f32 0.3275911, %v354_v32  ;;  %v371_v62 = vsub.f32 0.0, %v370_v51 }
  0x45   : > { %567 = vrcp.f32 %v317_v33 }
  0x46   : > { %v356_v35 = vadd.f32 1.0, %v355_v34  ;;  %v372_v10 = vmul.f32 1.442695, %v371_v62 }
  0x48   : > { %569 = vrcp.f32 %v356_v35 }
  0x49   : > { %571 = vpow2.f32 %v256_v47 }
  0x4a   : > { %573 = vpow2.f32 %v294_v53 }
  0x4b   : > { %575 = vpow2.f32 %v333_v1 }
  0x4c   : > { %577 = vpow2.f32 %v372_v10 }
  0x4e   : > { %v564_v37 = vpop.eup %563 }
  0x4f   : > { %v242_v39 = vmul.f32 %v564_v37, %v240_v22 }
  0x50   : > { %v566_v41 = vpop.eup %565 }
  0x51   : > { %v243_v42 = vsub.f32 2.0, %v242_v39  ;;  %v280_v43 = vmul.f32 %v566_v41, %v278_v28 }
  0x52   : > { %v568_v49 = vpop.eup %567 }
  0x53   : > { %v244_v46 = vmul.f32 %v564_v37, %v243_v42  ;;  %v281_v48 = vsub.f32 2.0, %v280_v43  ;;  %v319_v54 = vmul.f32 %v568_v49, %v317_v33 }
  0x55   : > { %v245_v50 = vmul.f32 1.0614054, %v244_v46  ;;  %v282_v52 = vmul.f32 %v566_v41, %v281_v48  ;;  %v570_v57 = vpop.eup %569  ;;  %v320_v59 = vsub.f32 2.0, %v319_v54 }
  0x56   : > { %v358_v61 = vmul.f32 %v570_v57, %v356_v35  ;;  %v572_v28 = vpop.eup %571 }
  0x57   : > { %v246_v56 = vadd.f32 -1.4531521, %v245_v50  ;;  %v283_v58 = vmul.f32 1.0614054, %v282_v52  ;;  %v321_v0 = vmul.f32 %v568_v49, %v320_v59  ;;  %v574_v36 = vpop.eup %573 }
  0x58   : > { %v359_v3 = vsub.f32 2.0, %v358_v61  ;;  %v576_v45 = vpop.eup %575 }
  0x59   : > { %v247_v60 = vmul.f32 %v246_v56, %v244_v46  ;;  %v284_v63 = vadd.f32 -1.4531521, %v283_v58  ;;  %v322_v6 = vmul.f32 1.0614054, %v321_v0 }
  0x5a   : > { %v360_v8 = vmul.f32 %v570_v57, %v359_v3  ;;  %v352_v3 = vmul.f32 0.5, %v749_v27 }
  0x5b   : > { %v248_v2 = vadd.f32 1.4214138, %v247_v60  ;;  %v285_v4 = vmul.f32 %v284_v63, %v282_v52  ;;  %v323_v13 = vadd.f32 -1.4531521, %v322_v6  ;;  %v313_v63 = vmul.f32 0.5, %v744_v21 }
  0x5c   : > { %v361_v16 = vmul.f32 1.0614054, %v360_v8 }
  0x5d   : > { %v249_v7 = vmul.f32 %v248_v2, %v244_v46  ;;  %v286_v12 = vadd.f32 1.4214138, %v285_v4  ;;  %v324_v18 = vmul.f32 %v323_v13, %v321_v0 }
  0x5e   : > { %v362_v20 = vadd.f32 -1.4531521, %v361_v16 }
  0x5f   : > { %v250_v15 = vadd.f32 -0.28449672, %v249_v7  ;;  %v287_v17 = vmul.f32 %v286_v12, %v282_v52  ;;  %v325_v23 = vadd.f32 1.4214138, %v324_v18 }
  0x60   : > { %v363_v25 = vmul.f32 %v362_v20, %v360_v8 }
  0x61   : > { %v251_v19 = vmul.f32 %v250_v15, %v244_v46  ;;  %v288_v22 = vadd.f32 -0.28449672, %v287_v17  ;;  %v326_v31 = vmul.f32 %v325_v23, %v321_v0 }
  0x62   : > { %v364_v33 = vadd.f32 1.4214138, %v363_v25 }
  0x63   : > { %v252_v24 = vadd.f32 0.2548296, %v251_v19  ;;  %v289_v29 = vmul.f32 %v288_v22, %v282_v52  ;;  %v327_v35 = vadd.f32 -0.28449672, %v326_v31 }
  0x64   : > { %v365_v38 = vmul.f32 %v364_v33, %v360_v8 }
  0x65   : > { %v253_v32 = vmul.f32 %v252_v24, %v244_v46  ;;  %v290_v34 = vadd.f32 0.2548296, %v289_v29  ;;  %v328_v40 = vmul.f32 %v327_v35, %v321_v0  ;;  %v236_v46 = vmul.f32 0.5, %v732_v5 }
  0x66   : > { %v366_v42 = vadd.f32 -0.28449672, %v365_v38 }
  0x67   : > { %v258_v37 = vmul.f32 %v572_v28, %v253_v32  ;;  %v291_v39 = vmul.f32 %v290_v34, %v282_v52  ;;  %v329_v44 = vadd.f32 0.2548296, %v328_v40  ;;  %v578_v52 = vpop.eup %577 }
  0x68   : > { %v367_v48 = vmul.f32 %v366_v42, %v360_v8 }
  0x69   : > { %v259_v41 = vsub.f32 1.0, %v258_v37  ;;  %v296_v43 = vmul.f32 %v574_v36, %v291_v39  ;;  %v330_v50 = vmul.f32 %v329_v44, %v321_v0 }
  0x6a   : > { %v368_v53 = vadd.f32 0.2548296, %v367_v48 }
  0x6b   : > { %v261_v47 = vsub.f32 0.0, %v259_v41  ;;  %v297_v49 = vsub.f32 1.0, %v296_v43  ;;  %v335_v56 = vmul.f32 %v576_v45, %v330_v50 }
  0x6c   : > { %v369_v57 = vmul.f32 %v368_v53, %v360_v8 }
  0x6d   : > { %v262_v51 = vsel %vm260_vm0, %v259_v41, %v261_v47  ;;  %v299_v55 = vsub.f32 0.0, %v297_v49  ;;  %v336_v59 = vsub.f32 1.0, %v335_v56 }
  0x6e   : > { %v263_v54 = vadd.f32 1.0, %v262_v51  ;;  %v374_v14 = vmul.f32 %v578_v52, %v369_v57 }
  0x6f   : > { %v300_v5 = vsel %vm298_vm1, %v297_v49, %v299_v55  ;;  %v338_v61 = vsub.f32 0.0, %v336_v59 }
  0x70   : > { %v264_v58 = vmul.f32 %v263_v54, %v236_v46  ;;  %v301_v60 = vadd.f32 1.0, %v300_v5  ;;  %v375_v0 = vsub.f32 1.0, %v374_v14 }
  0x71   : > { %v339_v1 = vsel %vm337_vm2, %v336_v59, %v338_v61 }
  0x72   : > { %265 = vst [vmem:[%s228_s21] sm:$0x3] %v264_v58  ;;  %v302_v62 = vmul.f32 %v301_v60, %v274_v9  ;;  %v340_v2 = vadd.f32 1.0, %v339_v1  ;;  %v377_v11 = vsub.f32 0.0, %v375_v0 }
  0x74   : > { %505 = vst [vmem:[%s228_s21 + $0x2] sm:$0x3] %v302_v62  ;;  %v341_v4 = vmul.f32 %v340_v2, %v313_v63  ;;  %v378_v6 = vsel %vm376_vm3, %v375_v0, %v377_v11 }
  0x75   : > { %v379_v7 = vadd.f32 1.0, %v378_v6 }
  0x76   : > { %509 = vst [vmem:[%s228_s21 + $0x4] sm:$0x3] %v341_v4 }
  0x77   : > { %v380_v26 = vmul.f32 %v379_v7, %v352_v3 }
  0x79   : > { %513 = vst [vmem:[%s228_s21 + $0x6] sm:$0x3] %v380_v26 }
  0x7a PF: > { %s15_s14 = sadd.s32 1, %s639_s14   ;;  %s798_s12 = smov %s635_s13 }
  0x7b   : > { %p12_p4 = scmp.ge.s32.totalorder %s15_s14, 4   ;;  %s799_s13 = smov %s801_s16 }
  0x7d   :  { %14 = sbr.rel (!%p12_p4) target bundleno = 3 (0x3), region = 77 }
  0x82   :  { %410 = vsyncpa [#allocation3], 1 }
  0x83   :  { %412 = vsyncpa [#allocation3 + $0x1], 1 }
  0x84   :  { %413 = vsyncpa [#allocation5], 1 }

</bundles_post_ra>
